<compile_context>
chip_gen: v7x
topology: tpu7x:2x2x1
jax: 0.10.0
libtpu: 0.0.40
codegen_flags: <defaults>
</compile_context>

<pallas_src>
import math

import jax
import jax.numpy as jnp
from jax import lax
from jax.experimental import pallas as pl
from jax.experimental.pallas import tpu as pltpu


def mha_decode_kernel(qh_ref, k_ref, v_ref, wk_ref, wv_ref,
                      scores_ref, m_ref, l_ref, acc_ref,
                      m_s, l_s, acc_s):
    """One (split, kv-tile) step of single-query attention with online softmax.

    Streams bf16 K/V tiles, projects them on the MXU with f32 accumulation,
    keeps per-head online-softmax state (m, l, acc) in f32 VMEM scratch and
    emits lane-dense raw scores [n_head, tile_k] for every tile.  Per-split
    partial (m, l, acc) are written once at the last step of each split; the
    normalization + output projection + LayerNorm happen in the wrapper.
    """
    step = pl.program_id(1)
    n_steps = pl.num_programs(1)

    @pl.when(step == 0)
    def _init():
        m_s[...] = jnp.full_like(m_s, -jnp.inf)
        l_s[...] = jnp.zeros_like(l_s)
        acc_s[...] = jnp.zeros_like(acc_s)

    # K / V projections of this tile (bf16 operands, f32 accumulation on MXU).
    # bk cancels in the softmax; bv is folded into the wrapper epilogue.
    kh = jnp.dot(k_ref[...], wk_ref[...], preferred_element_type=jnp.float32)
    vh = jnp.dot(v_ref[...], wv_ref[...], preferred_element_type=jnp.float32)

    # Per-head scores, lane-dense [n_head, tile_k].  qh_ref already carries the
    # 1/sqrt(d_k) scale and the per-head channel masking.
    s = lax.dot_general(qh_ref[...], kh, (((1,), (1,)), ((), ())),
                        preferred_element_type=jnp.float32)
    scores_ref[...] = s

    # Online softmax over the lane (key) axis.
    m_new = jnp.maximum(m_s[...], jnp.max(s, axis=-1, keepdims=True))   # [H, 1]
    alpha = jnp.exp(m_s[...] - m_new)                                   # [H, 1]
    p = jnp.exp(s - m_new)                                              # [H, tile_k]
    l_s[...] = l_s[...] * alpha + jnp.sum(p, axis=-1, keepdims=True)
    acc_s[...] = acc_s[...] * alpha + jnp.dot(p, vh, preferred_element_type=jnp.float32)
    m_s[...] = m_new

    @pl.when(step == n_steps - 1)
    def _finalize():
        m_ref[0] = m_s[...]
        l_ref[0] = l_s[...]
        acc_ref[0] = acc_s[...]


def multi_head_attention(q, k, v, params, *, tile_k=512, num_splits=1):
    """Pallas forward of the PyTorch MultiHeadAttention module (eval mode).

    q: [sz_b, len_q, d_model]   (only q[0, -1, :] is used, per the spec)
    k: [sz_b, len_k, d_model]
    v: [sz_b, len_v, d_model]   (len_v must equal len_k)
    num_splits: leading "parallel" grid axis (set 2 on v7x to use both TCs).
    returns (output [sz_b, 1, d_model], attn [n_head*sz_b, 1, len_k])
    """
    n_head, d_k, d_v = params["n_head"], params["d_k"], params["d_v"]
    sz_b, _, d_model = q.shape
    _, len_k, _ = k.shape
    _, len_v, _ = v.shape
    assert sz_b == 1, "torch module's view() implicitly requires sz_b == 1"
    assert len_v == len_k
    assert len_k % num_splits == 0, "len_k must divide evenly across splits"

    hd_k, hd_v = n_head * d_k, n_head * d_v
    per_split = len_k // num_splits
    tile = min(tile_k, per_split)
    assert per_split % tile == 0, "len_k / num_splits must be a multiple of tile_k"
    assert tile % 16 == 0, "bf16 K/V tiles need tile_k to be a multiple of 16"
    steps_per_split = per_split // tile
    inv_temp = 1.0 / math.sqrt(d_k)

    # Streamed operands stay bf16 (memory-bound kernel); f32 accumulation only.
    k2d = k.reshape(len_k, d_model).astype(jnp.bfloat16)
    v2d = v.reshape(len_v, d_model).astype(jnp.bfloat16)
    wk = params["wk"].astype(jnp.bfloat16)
    wv = params["wv"].astype(jnp.bfloat16)

    # Tiny O(d_model^2) single-token prologue in XLA: q projection, 1/temp and
    # per-head masking folded into a [H, H*d_k] query matrix.
    this_q = q[0, -1, :].astype(jnp.float32)                               # [d_model]
    qh = this_q @ params["wq"].astype(jnp.float32) + params["bq"].astype(jnp.float32)
    head_mask = (jnp.arange(hd_k)[None, :] // d_k
                 == jnp.arange(n_head)[:, None]).astype(jnp.float32)       # [H, H*d_k]
    qh_heads = (qh[None, :] * head_mask) * inv_temp                        # [H, H*d_k]

    grid = (num_splits, steps_per_split)

    def kv_map(s, t):
        return (s * steps_per_split + t, 0)

    # VMEM budget (explicit so large tiles don't hit the scoped default).
    b16, b32 = 2, 4
    kv_tile_bytes = 2 * 2 * tile * d_model * b16             # K+V, double-buffered
    score_tile_bytes = 2 * n_head * tile * b32                # streamed scores out
    weight_bytes = d_model * (hd_k + hd_v) * b16
    small_bytes = (n_head * hd_k + 8 * n_head * (hd_v + 2)) * b32
    needed = kv_tile_bytes + score_tile_bytes + 2 * weight_bytes + small_bytes
    vmem_limit = int(min(64 * 2 ** 20, max(4 * needed, 32 * 2 ** 20)))

    flops = int(2 * len_k * d_model * (hd_k + hd_v)           # K / V projections
                + 2 * len_k * n_head * (hd_k + hd_v))         # scores + weighted V
    transcendentals = int(2 * len_k * n_head)
    bytes_accessed = int(2 * len_k * d_model * b16 + weight_bytes
                         + n_head * (hd_k + len_k) * b32
                         + 3 * num_splits * n_head * (hd_v + 2) * b32)

    def build(single_buffer_resident):
        def resident(shape):
            # Constant-index-map operands never change blocks; single-buffer
            # them (halves their VMEM footprint — matters on v7x's 64 MiB).
            if single_buffer_resident:
                return pl.BlockSpec(shape, lambda s, t: (0,) * len(shape),
                                    pipeline_mode=pl.Buffered(1))
            return pl.BlockSpec(shape, lambda s, t: (0,) * len(shape))

        return pl.pallas_call(
            mha_decode_kernel,
            out_shape=(
                jax.ShapeDtypeStruct((n_head, len_k), jnp.float32),            # raw scores
                jax.ShapeDtypeStruct((num_splits, n_head, 1), jnp.float32),    # m partials
                jax.ShapeDtypeStruct((num_splits, n_head, 1), jnp.float32),    # l partials
                jax.ShapeDtypeStruct((num_splits, n_head, hd_v), jnp.float32), # acc partials
            ),
            grid_spec=pltpu.PrefetchScalarGridSpec(
                num_scalar_prefetch=0,
                grid=grid,
                in_specs=[
                    resident((n_head, hd_k)),                          # scaled per-head q
                    pl.BlockSpec((tile, d_model), kv_map),             # K tiles (streamed)
                    pl.BlockSpec((tile, d_model), kv_map),             # V tiles (streamed)
                    resident((d_model, hd_k)),                         # Wk
                    resident((d_model, hd_v)),                         # Wv
                ],
                out_specs=[
                    # lane-dense streamed raw scores
                    pl.BlockSpec((n_head, tile),
                                 lambda s, t: (0, s * steps_per_split + t)),
                    pl.BlockSpec((1, n_head, 1), lambda s, t: (s, 0, 0)),
                    pl.BlockSpec((1, n_head, 1), lambda s, t: (s, 0, 0)),
                    pl.BlockSpec((1, n_head, hd_v), lambda s, t: (s, 0, 0)),
                ],
                scratch_shapes=[
                    pltpu.VMEM((n_head, 1), jnp.float32),      # running max
                    pltpu.VMEM((n_head, 1), jnp.float32),      # running denom
                    pltpu.VMEM((n_head, hd_v), jnp.float32),   # weighted V
                ],
            ),
            compiler_params=pltpu.CompilerParams(
                dimension_semantics=("parallel", "arbitrary"),
                vmem_limit_bytes=vmem_limit,
            ),
            cost_estimate=pl.CostEstimate(
                flops=flops, transcendentals=transcendentals,
                bytes_accessed=bytes_accessed),
        )

    args = (qh_heads, k2d, v2d, wk, wv)
    try:
        scores, m_p, l_p, acc_p = build(True)(*args)
    except Exception:
        # Older jax/libtpu without BlockSpec pipeline_mode support: fall back
        # to default double-buffering for the resident operands.
        scores, m_p, l_p, acc_p = build(False)(*args)

    # ---- cross-split combine + epilogue in XLA (all [1, d_model]-scale work).
    m_f = jnp.max(m_p, axis=0)                                  # [H, 1]
    coef = jnp.exp(m_p - m_f[None])                             # [S, H, 1]
    l_f = jnp.sum(l_p * coef, axis=0)                           # [H, 1]
    ctx = jnp.sum(acc_p * coef, axis=0)                         # [H, H*d_v]

    attn = jnp.exp(scores - m_f) / l_f                          # [H, len_k]

    head_exp = (jnp.arange(hd_v)[None, :] // d_v
                == jnp.arange(n_head)[:, None]).astype(jnp.float32)        # [H, H*d_v]
    concat = jnp.sum((ctx / l_f) * head_exp, axis=0) + params["bv"].astype(jnp.float32)

    y = (concat @ params["wfc"].astype(jnp.float32)
         + params["bfc"].astype(jnp.float32) + this_q)          # residual = this_q
    mean = jnp.mean(y, keepdims=True)
    var = jnp.mean(jnp.square(y - mean), keepdims=True)
    y = (y - mean) * lax.rsqrt(var + 1e-5)
    y = y * params["gamma"].astype(jnp.float32) + params["beta"].astype(jnp.float32)

    output = y.reshape(sz_b, 1, d_model)
    attn = attn.reshape(n_head * sz_b, 1, len_k)
    return output, attn


def reference_forward(q, k, v, p):
    """Pure-JAX replica of the PyTorch forward (eval mode)."""
    sz_b, _, d_model = q.shape
    _, len_k, _ = k.shape
    n_head, d_k, d_v = p["n_head"], p["d_k"], p["d_v"]

    this_q = q[0, -1, :]
    residual = this_q
    qh = this_q @ p["wq"] + p["bq"]
    kh = k.reshape(-1, d_model) @ p["wk"] + p["bk"]
    vh = v.reshape(-1, d_model) @ p["wv"] + p["bv"]
    qh = qh.reshape(sz_b, 1, n_head, d_k)
    kh = kh.reshape(sz_b, len_k, n_head, d_k)
    vh = vh.reshape(sz_b, len_k, n_head, d_v)
    q3 = jnp.transpose(qh, (2, 0, 1, 3)).reshape(-1, 1, d_k)
    k3 = jnp.transpose(kh, (2, 0, 1, 3)).reshape(-1, len_k, d_k)
    v3 = jnp.transpose(vh, (2, 0, 1, 3)).reshape(-1, len_k, d_v)
    attn = jnp.einsum("hqd,hkd->hqk", q3, k3) / math.sqrt(d_k)
    attn = jax.nn.softmax(attn, axis=2)
    out = jnp.einsum("hqk,hkd->hqd", attn, v3)
    out = out.reshape(n_head, sz_b, 1, d_v)
    out = jnp.transpose(out, (1, 2, 0, 3)).reshape(sz_b, 1, n_head * d_v)
    out = out @ p["wfc"] + p["bfc"]
    y = out + residual
    mean = y.mean(-1, keepdims=True)
    var = ((y - mean) ** 2).mean(-1, keepdims=True)
    y = (y - mean) / jnp.sqrt(var + 1e-5) * p["gamma"] + p["beta"]
    return y, attn


if __name__ == "__main__":
    N_HEAD, D_MODEL, D_K, D_V = 4, 32, 8, 8
    SZ_B, LEN_Q, LEN_K = 1, 8, 512
    TILE_K, NUM_SPLITS = 128, 2

    key = jax.random.PRNGKey(0)
    ks = jax.random.split(key, 12)

    std_qk = math.sqrt(2.0 / (D_MODEL + D_K))
    std_v = math.sqrt(2.0 / (D_MODEL + D_V))
    std_fc = math.sqrt(2.0 / (N_HEAD * D_V + D_MODEL))   # xavier normal
    b_in = 1.0 / math.sqrt(D_MODEL)
    b_fc = 1.0 / math.sqrt(N_HEAD * D_V)

    def bf16_round(x):
        # The kernel streams these in bf16; round once so the f32 reference
        # sees identical numerics.
        return x.astype(jnp.bfloat16).astype(jnp.float32)

    params = dict(
        n_head=N_HEAD, d_k=D_K, d_v=D_V,
        wq=std_qk * jax.random.normal(ks[0], (D_MODEL, N_HEAD * D_K), jnp.float32),
        wk=bf16_round(std_qk * jax.random.normal(ks[1], (D_MODEL, N_HEAD * D_K), jnp.float32)),
        wv=bf16_round(std_v * jax.random.normal(ks[2], (D_MODEL, N_HEAD * D_V), jnp.float32)),
        wfc=std_fc * jax.random.normal(ks[3], (N_HEAD * D_V, D_MODEL), jnp.float32),
        bq=jax.random.uniform(ks[4], (N_HEAD * D_K,), jnp.float32, -b_in, b_in),
        bk=jax.random.uniform(ks[5], (N_HEAD * D_K,), jnp.float32, -b_in, b_in),
        bv=jax.random.uniform(ks[6], (N_HEAD * D_V,), jnp.float32, -b_in, b_in),
        bfc=jax.random.uniform(ks[7], (D_MODEL,), jnp.float32, -b_fc, b_fc),
        gamma=jnp.ones((D_MODEL,), jnp.float32),
        beta=jnp.zeros((D_MODEL,), jnp.float32),
    )

    q = jax.random.normal(ks[8], (SZ_B, LEN_Q, D_MODEL), jnp.float32)
    k = bf16_round(jax.random.normal(ks[9], (SZ_B, LEN_K, D_MODEL), jnp.float32))
    v = bf16_round(jax.random.normal(ks[10], (SZ_B, LEN_K, D_MODEL), jnp.float32))

    out, attn = multi_head_attention(q, k, v, params, tile_k=TILE_K, num_splits=NUM_SPLITS)
    out = jax.block_until_ready(out)
    attn = jax.block_until_ready(attn)

    ref_out, ref_attn = reference_forward(q, k, v, params)

    assert out.shape == (SZ_B, 1, D_MODEL)
    assert attn.shape == (N_HEAD * SZ_B, 1, LEN_K)
    # bf16 streaming => looser tolerances than a pure-f32 kernel.
    assert jnp.allclose(attn, ref_attn, atol=1e-4, rtol=3e-2), "attn mismatch vs reference"
    assert jnp.allclose(out, ref_out, atol=3e-2, rtol=3e-2), "output mismatch vs reference"

    print("KERNEL_OK")
</pallas_src>

<mosaic_0001>
module attributes {stable_mosaic.version = 11 : i64} {
  func.func @mha_decode_kernel(%arg0: i32, %arg1: i32, %arg2: memref<4x32xf32, #tpu.memory_space<vmem>>, %arg3: memref<128x32xbf16, #tpu.memory_space<vmem>>, %arg4: memref<128x32xbf16, #tpu.memory_space<vmem>>, %arg5: memref<32x32xbf16, #tpu.memory_space<vmem>>, %arg6: memref<32x32xbf16, #tpu.memory_space<vmem>>, %arg7: memref<4x128xf32, #tpu.memory_space<vmem>>, %arg8: memref<1x4x1xf32, #tpu.memory_space<vmem>>, %arg9: memref<1x4x1xf32, #tpu.memory_space<vmem>>, %arg10: memref<1x4x32xf32, #tpu.memory_space<vmem>>, %arg11: memref<4x1xf32, #tpu.memory_space<vmem>>, %arg12: memref<4x1xf32, #tpu.memory_space<vmem>>, %arg13: memref<4x32xf32, #tpu.memory_space<vmem>>) attributes {dimension_semantics = [#tpu.dimension_semantics<parallel>, #tpu.dimension_semantics<arbitrary>], iteration_bounds = array<i64: 2, 2>, scalar_prefetch = 0 : i64, scratch_operands = 3 : i64, tpu.core_type = #tpu.core_type<tc>, window_params = [{pipeline_mode = #tpu.pipeline_mode<synchronous>, transform_indices = @transform_0, window_bounds = array<i64: 4, 32>}, {transform_indices = @transform_1, window_bounds = array<i64: 128, 32>}, {transform_indices = @transform_2, window_bounds = array<i64: 128, 32>}, {pipeline_mode = #tpu.pipeline_mode<synchronous>, transform_indices = @transform_3, window_bounds = array<i64: 32, 32>}, {pipeline_mode = #tpu.pipeline_mode<synchronous>, transform_indices = @transform_4, window_bounds = array<i64: 32, 32>}, {transform_indices = @transform_5, window_bounds = array<i64: 4, 128>}, {transform_indices = @transform_6, window_bounds = array<i64: 1, 4, 1>}, {transform_indices = @transform_7, window_bounds = array<i64: 1, 4, 1>}, {transform_indices = @transform_8, window_bounds = array<i64: 1, 4, 32>}]} {
    %c0_i32 = arith.constant 0 : i32
    %0 = arith.cmpi eq, %arg1, %c0_i32 : i32
    %1 = arith.extui %0 : i1 to i32
    %c0_i32_0 = arith.constant 0 : i32
    %2 = arith.cmpi ne, %1, %c0_i32_0 : i32
    scf.if %2 {
      %cst_32 = arith.constant 0xFF800000 : f32
      %38 = vector.broadcast %cst_32 : f32 to vector<4x1xf32>
      %c0_33 = arith.constant 0 : index
      %c0_34 = arith.constant 0 : index
      %39 = vector.load %arg11[%c0_33, %c0_34] : memref<4x1xf32, #tpu.memory_space<vmem>>, vector<4x1xf32>
      tpu.vector_store %arg11[%c0_33, %c0_34], %38 {strides = array<i32>} : memref<4x1xf32, #tpu.memory_space<vmem>>, vector<4x1xf32>,
      %cst_35 = arith.constant 0.000000e+00 : f32
      %40 = vector.broadcast %cst_35 : f32 to vector<4x1xf32>
      %c0_36 = arith.constant 0 : index
      %c0_37 = arith.constant 0 : index
      %41 = vector.load %arg12[%c0_36, %c0_37] : memref<4x1xf32, #tpu.memory_space<vmem>>, vector<4x1xf32>
      tpu.vector_store %arg12[%c0_36, %c0_37], %40 {strides = array<i32>} : memref<4x1xf32, #tpu.memory_space<vmem>>, vector<4x1xf32>,
      %cst_38 = arith.constant 0.000000e+00 : f32
      %42 = vector.broadcast %cst_38 : f32 to vector<4x32xf32>
      %c0_39 = arith.constant 0 : index
      %c0_40 = arith.constant 0 : index
      %43 = vector.load %arg13[%c0_39, %c0_40] : memref<4x32xf32, #tpu.memory_space<vmem>>, vector<4x32xf32>
      tpu.vector_store %arg13[%c0_39, %c0_40], %42 {strides = array<i32>} : memref<4x32xf32, #tpu.memory_space<vmem>>, vector<4x32xf32>,
    } else {
    }
    %c0 = arith.constant 0 : index
    %c0_1 = arith.constant 0 : index
    %3 = vector.load %arg3[%c0, %c0_1] : memref<128x32xbf16, #tpu.memory_space<vmem>>, vector<128x32xbf16>
    %c0_2 = arith.constant 0 : index
    %c0_3 = arith.constant 0 : index
    %4 = vector.load %arg5[%c0_2, %c0_3] : memref<32x32xbf16, #tpu.memory_space<vmem>>, vector<32x32xbf16>
    %cst = arith.constant dense<0.000000e+00> : vector<128x32xf32>
    %5 = tpu.matmul %3, %4, %cst {dimension_numbers = #tpu.dot_dimension_numbers<[1], [0], [0], [1], [0, 0, 1, 1], [], []>} : vector<128x32xbf16>, vector<32x32xbf16>, vector<128x32xf32> -> vector<128x32xf32>
    %c0_4 = arith.constant 0 : index
    %c0_5 = arith.constant 0 : index
    %6 = vector.load %arg4[%c0_4, %c0_5] : memref<128x32xbf16, #tpu.memory_space<vmem>>, vector<128x32xbf16>
    %c0_6 = arith.constant 0 : index
    %c0_7 = arith.constant 0 : index
    %7 = vector.load %arg6[%c0_6, %c0_7] : memref<32x32xbf16, #tpu.memory_space<vmem>>, vector<32x32xbf16>
    %cst_8 = arith.constant dense<0.000000e+00> : vector<128x32xf32>
    %8 = tpu.matmul %6, %7, %cst_8 {dimension_numbers = #tpu.dot_dimension_numbers<[1], [0], [0], [1], [0, 0, 1, 1], [], []>} : vector<128x32xbf16>, vector<32x32xbf16>, vector<128x32xf32> -> vector<128x32xf32>
    %c0_9 = arith.constant 0 : index
    %c0_10 = arith.constant 0 : index
    %9 = vector.load %arg2[%c0_9, %c0_10] : memref<4x32xf32, #tpu.memory_space<vmem>>, vector<4x32xf32>
    %cst_11 = arith.constant dense<0.000000e+00> : vector<4x128xf32>
    %10 = tpu.matmul %9, %5, %cst_11 {dimension_numbers = #tpu.dot_dimension_numbers<[1], [1], [0], [0], [0, 0, 1, 0], [], []>} : vector<4x32xf32>, vector<128x32xf32>, vector<4x128xf32> -> vector<4x128xf32>
    %c0_12 = arith.constant 0 : index
    %c0_13 = arith.constant 0 : index
    %11 = vector.load %arg7[%c0_12, %c0_13] : memref<4x128xf32, #tpu.memory_space<vmem>>, vector<4x128xf32>
    tpu.vector_store %arg7[%c0_12, %c0_13], %10 {strides = array<i32>} : memref<4x128xf32, #tpu.memory_space<vmem>>, vector<4x128xf32>,
    %c0_14 = arith.constant 0 : index
    %c0_15 = arith.constant 0 : index
    %12 = vector.load %arg11[%c0_14, %c0_15] : memref<4x1xf32, #tpu.memory_space<vmem>>, vector<4x1xf32>
    %cst_16 = arith.constant dense<0xFF800000> : vector<4xf32>
    %13 = vector.multi_reduction <maximumf>, %10, %cst_16 [1] : vector<4x128xf32> to vector<4xf32>
    %14 = vector.shape_cast %13 : vector<4xf32> to vector<4x1xf32>
    %15 = arith.maximumf %12, %14 : vector<4x1xf32>
    %c0_17 = arith.constant 0 : index
    %c0_18 = arith.constant 0 : index
    %16 = vector.load %arg11[%c0_17, %c0_18] : memref<4x1xf32, #tpu.memory_space<vmem>>, vector<4x1xf32>
    %17 = arith.subf %16, %15 : vector<4x1xf32>
    %18 = math.exp %17 : vector<4x1xf32>
    %19 = vector.broadcast %15 : vector<4x1xf32> to vector<4x128xf32>
    %20 = arith.subf %10, %19 : vector<4x128xf32>
    %21 = math.exp %20 : vector<4x128xf32>
    %c0_19 = arith.constant 0 : index
    %c0_20 = arith.constant 0 : index
    %22 = vector.load %arg12[%c0_19, %c0_20] : memref<4x1xf32, #tpu.memory_space<vmem>>, vector<4x1xf32>
    %23 = arith.mulf %22, %18 : vector<4x1xf32>
    %cst_21 = arith.constant dense<0.000000e+00> : vector<4xf32>
    %24 = vector.multi_reduction <add>, %21, %cst_21 [1] : vector<4x128xf32> to vector<4xf32>
    %25 = vector.shape_cast %24 : vector<4xf32> to vector<4x1xf32>
    %26 = arith.addf %23, %25 : vector<4x1xf32>
    %c0_22 = arith.constant 0 : index
    %c0_23 = arith.constant 0 : index
    %27 = vector.load %arg12[%c0_22, %c0_23] : memref<4x1xf32, #tpu.memory_space<vmem>>, vector<4x1xf32>
    tpu.vector_store %arg12[%c0_22, %c0_23], %26 {strides = array<i32>} : memref<4x1xf32, #tpu.memory_space<vmem>>, vector<4x1xf32>,
    %c0_24 = arith.constant 0 : index
    %c0_25 = arith.constant 0 : index
    %28 = vector.load %arg13[%c0_24, %c0_25] : memref<4x32xf32, #tpu.memory_space<vmem>>, vector<4x32xf32>
    %29 = vector.broadcast %18 : vector<4x1xf32> to vector<4x32xf32>
    %30 = arith.mulf %28, %29 : vector<4x32xf32>
    %cst_26 = arith.constant dense<0.000000e+00> : vector<4x32xf32>
    %31 = tpu.matmul %21, %8, %cst_26 {dimension_numbers = #tpu.dot_dimension_numbers<[1], [0], [0], [1], [0, 0, 1, 1], [], []>} : vector<4x128xf32>, vector<128x32xf32>, vector<4x32xf32> -> vector<4x32xf32>
    %32 = arith.addf %30, %31 : vector<4x32xf32>
    %c0_27 = arith.constant 0 : index
    %c0_28 = arith.constant 0 : index
    %33 = vector.load %arg13[%c0_27, %c0_28] : memref<4x32xf32, #tpu.memory_space<vmem>>, vector<4x32xf32>
    tpu.vector_store %arg13[%c0_27, %c0_28], %32 {strides = array<i32>} : memref<4x32xf32, #tpu.memory_space<vmem>>, vector<4x32xf32>,
    %c0_29 = arith.constant 0 : index
    %c0_30 = arith.constant 0 : index
    %34 = vector.load %arg11[%c0_29, %c0_30] : memref<4x1xf32, #tpu.memory_space<vmem>>, vector<4x1xf32>
    tpu.vector_store %arg11[%c0_29, %c0_30], %15 {strides = array<i32>} : memref<4x1xf32, #tpu.memory_space<vmem>>, vector<4x1xf32>,
    %c1_i32 = arith.constant 1 : i32
    %35 = arith.cmpi eq, %arg1, %c1_i32 : i32
    %36 = arith.extui %35 : i1 to i32
    %c0_i32_31 = arith.constant 0 : i32
    %37 = arith.cmpi ne, %36, %c0_i32_31 : i32
    scf.if %37 {
      %c0_32 = arith.constant 0 : index
      %c0_33 = arith.constant 0 : index
      %38 = vector.load %arg11[%c0_32, %c0_33] : memref<4x1xf32, #tpu.memory_space<vmem>>, vector<4x1xf32>
      %c0_34 = arith.constant 0 : index
      %c0_35 = arith.constant 0 : index
      %c0_36 = arith.constant 0 : index
      %39 = vector.load %arg8[%c0_34, %c0_35, %c0_36] : memref<1x4x1xf32, #tpu.memory_space<vmem>>, vector<1x4x1xf32>
      %40 = vector.shape_cast %39 : vector<1x4x1xf32> to vector<4x1xf32>
      %41 = vector.shape_cast %38 : vector<4x1xf32> to vector<1x4x1xf32>
      tpu.vector_store %arg8[%c0_34, %c0_35, %c0_36], %41 {strides = array<i32>} : memref<1x4x1xf32, #tpu.memory_space<vmem>>, vector<1x4x1xf32>,
      %c0_37 = arith.constant 0 : index
      %c0_38 = arith.constant 0 : index
      %42 = vector.load %arg12[%c0_37, %c0_38] : memref<4x1xf32, #tpu.memory_space<vmem>>, vector<4x1xf32>
      %c0_39 = arith.constant 0 : index
      %c0_40 = arith.constant 0 : index
      %c0_41 = arith.constant 0 : index
      %43 = vector.load %arg9[%c0_39, %c0_40, %c0_41] : memref<1x4x1xf32, #tpu.memory_space<vmem>>, vector<1x4x1xf32>
      %44 = vector.shape_cast %43 : vector<1x4x1xf32> to vector<4x1xf32>
      %45 = vector.shape_cast %42 : vector<4x1xf32> to vector<1x4x1xf32>
      tpu.vector_store %arg9[%c0_39, %c0_40, %c0_41], %45 {strides = array<i32>} : memref<1x4x1xf32, #tpu.memory_space<vmem>>, vector<1x4x1xf32>,
      %c0_42 = arith.constant 0 : index
      %c0_43 = arith.constant 0 : index
      %46 = vector.load %arg13[%c0_42, %c0_43] : memref<4x32xf32, #tpu.memory_space<vmem>>, vector<4x32xf32>
      %c0_44 = arith.constant 0 : index
      %c0_45 = arith.constant 0 : index
      %c0_46 = arith.constant 0 : index
      %47 = vector.load %arg10[%c0_44, %c0_45, %c0_46] : memref<1x4x32xf32, #tpu.memory_space<vmem>>, vector<1x4x32xf32>
      %48 = vector.shape_cast %47 : vector<1x4x32xf32> to vector<4x32xf32>
      %49 = vector.shape_cast %46 : vector<4x32xf32> to vector<1x4x32xf32>
      tpu.vector_store %arg10[%c0_44, %c0_45, %c0_46], %49 {strides = array<i32>} : memref<1x4x32xf32, #tpu.memory_space<vmem>>, vector<1x4x32xf32>,
    } else {
    }
    return
  }
  func.func @transform_0(%arg0: i32, %arg1: i32) -> (i32, i32) {
    %c0_i32 = arith.constant 0 : i32
    %c0_i32_0 = arith.constant 0 : i32
    %c0_i32_1 = arith.constant 0 : i32
    return %c0_i32, %c0_i32_0 : i32, i32
  }
  func.func @transform_1(%arg0: i32, %arg1: i32) -> (i32, i32) {
    %c2_i32 = arith.constant 2 : i32
    %0 = arith.muli %arg0, %c2_i32 : i32
    %1 = arith.addi %0, %arg1 : i32
    %c0_i32 = arith.constant 0 : i32
    %c0_i32_0 = arith.constant 0 : i32
    return %1, %c0_i32 : i32, i32
  }
  func.func @transform_2(%arg0: i32, %arg1: i32) -> (i32, i32) {
    %c2_i32 = arith.constant 2 : i32
    %0 = arith.muli %arg0, %c2_i32 : i32
    %1 = arith.addi %0, %arg1 : i32
    %c0_i32 = arith.constant 0 : i32
    %c0_i32_0 = arith.constant 0 : i32
    return %1, %c0_i32 : i32, i32
  }
  func.func @transform_3(%arg0: i32, %arg1: i32) -> (i32, i32) {
    %c0_i32 = arith.constant 0 : i32
    %c0_i32_0 = arith.constant 0 : i32
    %c0_i32_1 = arith.constant 0 : i32
    return %c0_i32, %c0_i32_0 : i32, i32
  }
  func.func @transform_4(%arg0: i32, %arg1: i32) -> (i32, i32) {
    %c0_i32 = arith.constant 0 : i32
    %c0_i32_0 = arith.constant 0 : i32
    %c0_i32_1 = arith.constant 0 : i32
    return %c0_i32, %c0_i32_0 : i32, i32
  }
  func.func @transform_5(%arg0: i32, %arg1: i32) -> (i32, i32) {
    %c2_i32 = arith.constant 2 : i32
    %0 = arith.muli %arg0, %c2_i32 : i32
    %1 = arith.addi %0, %arg1 : i32
    %c0_i32 = arith.constant 0 : i32
    %c0_i32_0 = arith.constant 0 : i32
    return %c0_i32, %1 : i32, i32
  }
  func.func @transform_6(%arg0: i32, %arg1: i32) -> (i32, i32, i32) {
    %c0_i32 = arith.constant 0 : i32
    %c0_i32_0 = arith.constant 0 : i32
    %c0_i32_1 = arith.constant 0 : i32
    return %arg0, %c0_i32, %c0_i32_0 : i32, i32, i32
  }
  func.func @transform_7(%arg0: i32, %arg1: i32) -> (i32, i32, i32) {
    %c0_i32 = arith.constant 0 : i32
    %c0_i32_0 = arith.constant 0 : i32
    %c0_i32_1 = arith.constant 0 : i32
    return %arg0, %c0_i32, %c0_i32_0 : i32, i32, i32
  }
  func.func @transform_8(%arg0: i32, %arg1: i32) -> (i32, i32, i32) {
    %c0_i32 = arith.constant 0 : i32
    %c0_i32_0 = arith.constant 0 : i32
    %c0_i32_1 = arith.constant 0 : i32
    return %arg0, %c0_i32, %c0_i32_0 : i32, i32, i32
  }
}

module attributes {stable_mosaic.version = 11 : i64} {
  func.func @mha_decode_kernel(%arg0: i32, %arg1: i32, %arg2: memref<4x32xf32, #tpu.memory_space<vmem>>, %arg3: memref<128x32xbf16, #tpu.memory_space<vmem>>, %arg4: memref<128x32xbf16, #tpu.memory_space<vmem>>, %arg5: memref<32x32xbf16, #tpu.memory_space<vmem>>, %arg6: memref<32x32xbf16, #tpu.memory_space<vmem>>, %arg7: memref<4x128xf32, #tpu.memory_space<vmem>>, %arg8: memref<1x4x1xf32, #tpu.memory_space<vmem>>, %arg9: memref<1x4x1xf32, #tpu.memory_space<vmem>>, %arg10: memref<1x4x32xf32, #tpu.memory_space<vmem>>, %arg11: memref<4x1xf32, #tpu.memory_space<vmem>>, %arg12: memref<4x1xf32, #tpu.memory_space<vmem>>, %arg13: memref<4x32xf32, #tpu.memory_space<vmem>>) attributes {dimension_semantics = [#tpu.dimension_semantics<parallel>, #tpu.dimension_semantics<arbitrary>], iteration_bounds = array<i64: 2, 2>, scalar_prefetch = 0 : i64, scratch_operands = 3 : i64, tpu.core_type = #tpu.core_type<tc>, window_params = [{pipeline_mode = #tpu.pipeline_mode<synchronous>, transform_indices = @transform_0, window_bounds = array<i64: 4, 32>}, {transform_indices = @transform_1, window_bounds = array<i64: 128, 32>}, {transform_indices = @transform_2, window_bounds = array<i64: 128, 32>}, {pipeline_mode = #tpu.pipeline_mode<synchronous>, transform_indices = @transform_3, window_bounds = array<i64: 32, 32>}, {pipeline_mode = #tpu.pipeline_mode<synchronous>, transform_indices = @transform_4, window_bounds = array<i64: 32, 32>}, {transform_indices = @transform_5, window_bounds = array<i64: 4, 128>}, {transform_indices = @transform_6, window_bounds = array<i64: 1, 4, 1>}, {transform_indices = @transform_7, window_bounds = array<i64: 1, 4, 1>}, {transform_indices = @transform_8, window_bounds = array<i64: 1, 4, 32>}]} {
    %c0_i32 = arith.constant 0 : i32
    %0 = arith.cmpi eq, %arg1, %c0_i32 : i32
    %1 = arith.extui %0 : i1 to i32
    %c0_i32_0 = arith.constant 0 : i32
    %2 = arith.cmpi ne, %1, %c0_i32_0 : i32
    scf.if %2 {
      %cst_32 = arith.constant 0xFF800000 : f32
      %38 = vector.broadcast %cst_32 : f32 to vector<4x1xf32>
      %c0_33 = arith.constant 0 : index
      %c0_34 = arith.constant 0 : index
      %39 = vector.load %arg11[%c0_33, %c0_34] : memref<4x1xf32, #tpu.memory_space<vmem>>, vector<4x1xf32>
      tpu.vector_store %arg11[%c0_33, %c0_34], %38 {strides = array<i32>} : memref<4x1xf32, #tpu.memory_space<vmem>>, vector<4x1xf32>,
      %cst_35 = arith.constant 0.000000e+00 : f32
      %40 = vector.broadcast %cst_35 : f32 to vector<4x1xf32>
      %c0_36 = arith.constant 0 : index
      %c0_37 = arith.constant 0 : index
      %41 = vector.load %arg12[%c0_36, %c0_37] : memref<4x1xf32, #tpu.memory_space<vmem>>, vector<4x1xf32>
      tpu.vector_store %arg12[%c0_36, %c0_37], %40 {strides = array<i32>} : memref<4x1xf32, #tpu.memory_space<vmem>>, vector<4x1xf32>,
      %cst_38 = arith.constant 0.000000e+00 : f32
      %42 = vector.broadcast %cst_38 : f32 to vector<4x32xf32>
      %c0_39 = arith.constant 0 : index
      %c0_40 = arith.constant 0 : index
      %43 = vector.load %arg13[%c0_39, %c0_40] : memref<4x32xf32, #tpu.memory_space<vmem>>, vector<4x32xf32>
      tpu.vector_store %arg13[%c0_39, %c0_40], %42 {strides = array<i32>} : memref<4x32xf32, #tpu.memory_space<vmem>>, vector<4x32xf32>,
    } else {
    }
    %c0 = arith.constant 0 : index
    %c0_1 = arith.constant 0 : index
    %3 = vector.load %arg3[%c0, %c0_1] : memref<128x32xbf16, #tpu.memory_space<vmem>>, vector<128x32xbf16>
    %c0_2 = arith.constant 0 : index
    %c0_3 = arith.constant 0 : index
    %4 = vector.load %arg5[%c0_2, %c0_3] : memref<32x32xbf16, #tpu.memory_space<vmem>>, vector<32x32xbf16>
    %cst = arith.constant dense<0.000000e+00> : vector<128x32xf32>
    %5 = tpu.matmul %3, %4, %cst {dimension_numbers = #tpu.dot_dimension_numbers<[1], [0], [0], [1], [0, 0, 1, 1], [], []>} : vector<128x32xbf16>, vector<32x32xbf16>, vector<128x32xf32> -> vector<128x32xf32>
    %c0_4 = arith.constant 0 : index
    %c0_5 = arith.constant 0 : index
    %6 = vector.load %arg4[%c0_4, %c0_5] : memref<128x32xbf16, #tpu.memory_space<vmem>>, vector<128x32xbf16>
    %c0_6 = arith.constant 0 : index
    %c0_7 = arith.constant 0 : index
    %7 = vector.load %arg6[%c0_6, %c0_7] : memref<32x32xbf16, #tpu.memory_space<vmem>>, vector<32x32xbf16>
    %cst_8 = arith.constant dense<0.000000e+00> : vector<128x32xf32>
    %8 = tpu.matmul %6, %7, %cst_8 {dimension_numbers = #tpu.dot_dimension_numbers<[1], [0], [0], [1], [0, 0, 1, 1], [], []>} : vector<128x32xbf16>, vector<32x32xbf16>, vector<128x32xf32> -> vector<128x32xf32>
    %c0_9 = arith.constant 0 : index
    %c0_10 = arith.constant 0 : index
    %9 = vector.load %arg2[%c0_9, %c0_10] : memref<4x32xf32, #tpu.memory_space<vmem>>, vector<4x32xf32>
    %cst_11 = arith.constant dense<0.000000e+00> : vector<4x128xf32>
    %10 = tpu.matmul %9, %5, %cst_11 {dimension_numbers = #tpu.dot_dimension_numbers<[1], [1], [0], [0], [0, 0, 1, 0], [], []>} : vector<4x32xf32>, vector<128x32xf32>, vector<4x128xf32> -> vector<4x128xf32>
    %c0_12 = arith.constant 0 : index
    %c0_13 = arith.constant 0 : index
    %11 = vector.load %arg7[%c0_12, %c0_13] : memref<4x128xf32, #tpu.memory_space<vmem>>, vector<4x128xf32>
    tpu.vector_store %arg7[%c0_12, %c0_13], %10 {strides = array<i32>} : memref<4x128xf32, #tpu.memory_space<vmem>>, vector<4x128xf32>,
    %c0_14 = arith.constant 0 : index
    %c0_15 = arith.constant 0 : index
    %12 = vector.load %arg11[%c0_14, %c0_15] : memref<4x1xf32, #tpu.memory_space<vmem>>, vector<4x1xf32>
    %cst_16 = arith.constant dense<0xFF800000> : vector<4xf32>
    %13 = vector.multi_reduction <maximumf>, %10, %cst_16 [1] : vector<4x128xf32> to vector<4xf32>
    %14 = vector.shape_cast %13 : vector<4xf32> to vector<4x1xf32>
    %15 = arith.maximumf %12, %14 : vector<4x1xf32>
    %c0_17 = arith.constant 0 : index
    %c0_18 = arith.constant 0 : index
    %16 = vector.load %arg11[%c0_17, %c0_18] : memref<4x1xf32, #tpu.memory_space<vmem>>, vector<4x1xf32>
    %17 = arith.subf %16, %15 : vector<4x1xf32>
    %18 = math.exp %17 : vector<4x1xf32>
    %19 = vector.broadcast %15 : vector<4x1xf32> to vector<4x128xf32>
    %20 = arith.subf %10, %19 : vector<4x128xf32>
    %21 = math.exp %20 : vector<4x128xf32>
    %c0_19 = arith.constant 0 : index
    %c0_20 = arith.constant 0 : index
    %22 = vector.load %arg12[%c0_19, %c0_20] : memref<4x1xf32, #tpu.memory_space<vmem>>, vector<4x1xf32>
    %23 = arith.mulf %22, %18 : vector<4x1xf32>
    %cst_21 = arith.constant dense<0.000000e+00> : vector<4xf32>
    %24 = vector.multi_reduction <add>, %21, %cst_21 [1] : vector<4x128xf32> to vector<4xf32>
    %25 = vector.shape_cast %24 : vector<4xf32> to vector<4x1xf32>
    %26 = arith.addf %23, %25 : vector<4x1xf32>
    %c0_22 = arith.constant 0 : index
    %c0_23 = arith.constant 0 : index
    %27 = vector.load %arg12[%c0_22, %c0_23] : memref<4x1xf32, #tpu.memory_space<vmem>>, vector<4x1xf32>
    tpu.vector_store %arg12[%c0_22, %c0_23], %26 {strides = array<i32>} : memref<4x1xf32, #tpu.memory_space<vmem>>, vector<4x1xf32>,
    %c0_24 = arith.constant 0 : index
    %c0_25 = arith.constant 0 : index
    %28 = vector.load %arg13[%c0_24, %c0_25] : memref<4x32xf32, #tpu.memory_space<vmem>>, vector<4x32xf32>
    %29 = vector.broadcast %18 : vector<4x1xf32> to vector<4x32xf32>
    %30 = arith.mulf %28, %29 : vector<4x32xf32>
    %cst_26 = arith.constant dense<0.000000e+00> : vector<4x32xf32>
    %31 = tpu.matmul %21, %8, %cst_26 {dimension_numbers = #tpu.dot_dimension_numbers<[1], [0], [0], [1], [0, 0, 1, 1], [], []>} : vector<4x128xf32>, vector<128x32xf32>, vector<4x32xf32> -> vector<4x32xf32>
    %32 = arith.addf %30, %31 : vector<4x32xf32>
    %c0_27 = arith.constant 0 : index
    %c0_28 = arith.constant 0 : index
    %33 = vector.load %arg13[%c0_27, %c0_28] : memref<4x32xf32, #tpu.memory_space<vmem>>, vector<4x32xf32>
    tpu.vector_store %arg13[%c0_27, %c0_28], %32 {strides = array<i32>} : memref<4x32xf32, #tpu.memory_space<vmem>>, vector<4x32xf32>,
    %c0_29 = arith.constant 0 : index
    %c0_30 = arith.constant 0 : index
    %34 = vector.load %arg11[%c0_29, %c0_30] : memref<4x1xf32, #tpu.memory_space<vmem>>, vector<4x1xf32>
    tpu.vector_store %arg11[%c0_29, %c0_30], %15 {strides = array<i32>} : memref<4x1xf32, #tpu.memory_space<vmem>>, vector<4x1xf32>,
    %c1_i32 = arith.constant 1 : i32
    %35 = arith.cmpi eq, %arg1, %c1_i32 : i32
    %36 = arith.extui %35 : i1 to i32
    %c0_i32_31 = arith.constant 0 : i32
    %37 = arith.cmpi ne, %36, %c0_i32_31 : i32
    scf.if %37 {
      %c0_32 = arith.constant 0 : index
      %c0_33 = arith.constant 0 : index
      %38 = vector.load %arg11[%c0_32, %c0_33] : memref<4x1xf32, #tpu.memory_space<vmem>>, vector<4x1xf32>
      %c0_34 = arith.constant 0 : index
      %c0_35 = arith.constant 0 : index
      %c0_36 = arith.constant 0 : index
      %39 = vector.load %arg8[%c0_34, %c0_35, %c0_36] : memref<1x4x1xf32, #tpu.memory_space<vmem>>, vector<1x4x1xf32>
      %40 = vector.shape_cast %39 : vector<1x4x1xf32> to vector<4x1xf32>
      %41 = vector.shape_cast %38 : vector<4x1xf32> to vector<1x4x1xf32>
      tpu.vector_store %arg8[%c0_34, %c0_35, %c0_36], %41 {strides = array<i32>} : memref<1x4x1xf32, #tpu.memory_space<vmem>>, vector<1x4x1xf32>,
      %c0_37 = arith.constant 0 : index
      %c0_38 = arith.constant 0 : index
      %42 = vector.load %arg12[%c0_37, %c0_38] : memref<4x1xf32, #tpu.memory_space<vmem>>, vector<4x1xf32>
      %c0_39 = arith.constant 0 : index
      %c0_40 = arith.constant 0 : index
      %c0_41 = arith.constant 0 : index
      %43 = vector.load %arg9[%c0_39, %c0_40, %c0_41] : memref<1x4x1xf32, #tpu.memory_space<vmem>>, vector<1x4x1xf32>
      %44 = vector.shape_cast %43 : vector<1x4x1xf32> to vector<4x1xf32>
      %45 = vector.shape_cast %42 : vector<4x1xf32> to vector<1x4x1xf32>
      tpu.vector_store %arg9[%c0_39, %c0_40, %c0_41], %45 {strides = array<i32>} : memref<1x4x1xf32, #tpu.memory_space<vmem>>, vector<1x4x1xf32>,
      %c0_42 = arith.constant 0 : index
      %c0_43 = arith.constant 0 : index
      %46 = vector.load %arg13[%c0_42, %c0_43] : memref<4x32xf32, #tpu.memory_space<vmem>>, vector<4x32xf32>
      %c0_44 = arith.constant 0 : index
      %c0_45 = arith.constant 0 : index
      %c0_46 = arith.constant 0 : index
      %47 = vector.load %arg10[%c0_44, %c0_45, %c0_46] : memref<1x4x32xf32, #tpu.memory_space<vmem>>, vector<1x4x32xf32>
      %48 = vector.shape_cast %47 : vector<1x4x32xf32> to vector<4x32xf32>
      %49 = vector.shape_cast %46 : vector<4x32xf32> to vector<1x4x32xf32>
      tpu.vector_store %arg10[%c0_44, %c0_45, %c0_46], %49 {strides = array<i32>} : memref<1x4x32xf32, #tpu.memory_space<vmem>>, vector<1x4x32xf32>,
    } else {
    }
    return
  }
  func.func @transform_0(%arg0: i32, %arg1: i32) -> (i32, i32) {
    %c0_i32 = arith.constant 0 : i32
    %c0_i32_0 = arith.constant 0 : i32
    %c0_i32_1 = arith.constant 0 : i32
    return %c0_i32, %c0_i32_0 : i32, i32
  }
  func.func @transform_1(%arg0: i32, %arg1: i32) -> (i32, i32) {
    %c2_i32 = arith.constant 2 : i32
    %0 = arith.muli %arg0, %c2_i32 : i32
    %1 = arith.addi %0, %arg1 : i32
    %c0_i32 = arith.constant 0 : i32
    %c0_i32_0 = arith.constant 0 : i32
    return %1, %c0_i32 : i32, i32
  }
  func.func @transform_2(%arg0: i32, %arg1: i32) -> (i32, i32) {
    %c2_i32 = arith.constant 2 : i32
    %0 = arith.muli %arg0, %c2_i32 : i32
    %1 = arith.addi %0, %arg1 : i32
    %c0_i32 = arith.constant 0 : i32
    %c0_i32_0 = arith.constant 0 : i32
    return %1, %c0_i32 : i32, i32
  }
  func.func @transform_3(%arg0: i32, %arg1: i32) -> (i32, i32) {
    %c0_i32 = arith.constant 0 : i32
    %c0_i32_0 = arith.constant 0 : i32
    %c0_i32_1 = arith.constant 0 : i32
    return %c0_i32, %c0_i32_0 : i32, i32
  }
  func.func @transform_4(%arg0: i32, %arg1: i32) -> (i32, i32) {
    %c0_i32 = arith.constant 0 : i32
    %c0_i32_0 = arith.constant 0 : i32
    %c0_i32_1 = arith.constant 0 : i32
    return %c0_i32, %c0_i32_0 : i32, i32
  }
  func.func @transform_5(%arg0: i32, %arg1: i32) -> (i32, i32) {
    %c2_i32 = arith.constant 2 : i32
    %0 = arith.muli %arg0, %c2_i32 : i32
    %1 = arith.addi %0, %arg1 : i32
    %c0_i32 = arith.constant 0 : i32
    %c0_i32_0 = arith.constant 0 : i32
    return %c0_i32, %1 : i32, i32
  }
  func.func @transform_6(%arg0: i32, %arg1: i32) -> (i32, i32, i32) {
    %c0_i32 = arith.constant 0 : i32
    %c0_i32_0 = arith.constant 0 : i32
    %c0_i32_1 = arith.constant 0 : i32
    return %arg0, %c0_i32, %c0_i32_0 : i32, i32, i32
  }
  func.func @transform_7(%arg0: i32, %arg1: i32) -> (i32, i32, i32) {
    %c0_i32 = arith.constant 0 : i32
    %c0_i32_0 = arith.constant 0 : i32
    %c0_i32_1 = arith.constant 0 : i32
    return %arg0, %c0_i32, %c0_i32_0 : i32, i32, i32
  }
  func.func @transform_8(%arg0: i32, %arg1: i32) -> (i32, i32, i32) {
    %c0_i32 = arith.constant 0 : i32
    %c0_i32_0 = arith.constant 0 : i32
    %c0_i32_1 = arith.constant 0 : i32
    return %arg0, %c0_i32, %c0_i32_0 : i32, i32, i32
  }
}

</mosaic_0001>

<bundles_post_ra>
// kernel: tpu_custom_call.1
= control target key start
LH: loop header
LB: loop body
LE: loop exit
PB: predicated region body
PF: predicated region fallthrough
CT: control target
= control target key end

     0   :  { %s2250_s0 = inlined_call_operand.vmem [shape: f32[4,32], index: 0, kind: input, shape index: {}]   ;;  %s2251_s1 = inlined_call_operand.vmem [shape: bf16[512,32], index: 1, kind: input, shape index: {}]   ;;  %s2252_s2 = inlined_call_operand.vmem [shape: bf16[512,32], index: 2, kind: input, shape index: {}]   ;;  %s2253_s3 = inlined_call_operand.vmem [shape: bf16[32,32], index: 3, kind: input, shape index: {}]   ;;  %s2254_s4 = inlined_call_operand.vmem [shape: bf16[32,32], index: 4, kind: input, shape index: {}]   ;;  %s2255_s5 = inlined_call_operand.hbm [shape: f32[4,512], index: 5, kind: output, shape index: {0}]   ;;  %s2256_s6 = inlined_call_operand.vmem [shape: f32[2,4,1], index: 6, kind: output, shape index: {1}]   ;;  %s2257_s7 = inlined_call_operand.vmem [shape: f32[2,4,1], index: 7, kind: output, shape index: {2}]   ;;  %s2258_s8 = inlined_call_operand.hbm [shape: f32[2,4,32], index: 8, kind: output, shape index: {3}]  }
   0x1   :  { %2277 = sst [smem:[#allocation25_spill]] %s2255_s5 }
   0x2   :  { %2278 = sst [smem:[#allocation26_spill]] %s2258_s8 }
   0x3   :  { %14 = vsyncpa [#allocation6], 0 }
   0x4   :  { %16 = vsyncpa [#allocation6 + $0x1], 0 }
   0x5   :  { %17 = vsyncpa [#allocation8], 0 }
   0x6   :  { %19 = vsyncpa [#allocation8 + $0x1], 0  ;;  %s1893_s27 = smov 0   ;;  %s1895_s28 = smov 0  }
   0x7   :  { %s1897_s29 = smov 0   ;;  %s1899_s30 = smov 0  }
   0x8   :  { %s1901_s9 = smov 0   ;;  %s1903_s10 = smov 0  }
   0x9   :  { %s1905_s11 = smov 0   ;;  %s1907_s12 = smov 0  }
   0xa   :  { %s1909_s13 = smov 0   ;;  %s1911_s14 = smov 0  }
   0xb   :  { %s1913_s15 = smov 0  }
   0xc LB: > { %2279 = sst [smem:[#allocation11_spill]] %s1798_s27  ;;  %s1253_s16 = sadd.s32 4294967295, %s1838_s15   ;;  %s1838_s15 = sphi %s1913_s15, %s25_s15   ;;  %s1834_s14 = sphi %s1911_s14, %s2318_s14   ;;  %s1830_s13 = sphi %s1909_s13, %s2317_s13   ;;  %s1826_s12 = sphi %s1907_s12, %s2316_s12   ;;  %s1822_s11 = sphi %s1905_s11, %s2315_s11   ;;  %s1818_s10 = sphi %s1903_s10, %s2314_s10   ;;  %s1814_s9 = sphi %s1901_s9, %s2322_s9   ;;  %s1810_s30 = sphi %s1899_s30, %s2321_s30   ;;  %s1806_s29 = sphi %s1897_s29, %s2312_s29   ;;  %s1802_s28 = sphi %s1895_s28, %s2320_s28   ;;  %s1798_s27 = sphi %s1893_s27, %s2319_s27  }
   0xd   : > { %2280 = sst [smem:[#allocation12_spill]] %s1806_s29  ;;  %s1254_s17 = sadd.s32 4294967294, %s1838_s15  }
   0xe   : > { %2281 = sst [smem:[#allocation13_spill]] %s1810_s30  ;;  %s34_s18 = sadd.s32 1, %s1830_s13 }
   0xf   : > { %2282 = sst [smem:[#allocation14_spill]] %s1818_s10  ;;  %s37_s19 = sadd.s32 1, %s1834_s14 }
  0x10   : > { %2283 = sst [smem:[#allocation15_spill]] %s1830_s13  ;;  %p35_p0 = scmp.ge.s32.totalorder %s34_s18, 2 }
  0x11   : > { %2284 = sst [smem:[#allocation16_spill]] %s1834_s14  ;;  %s1259_s20 = sshll.u32 %s1834_s14, 1 }
  0x12   : > { %2285 = sst [smem:[#allocation17_spill]] %s1838_s15  ;;  %s165_s21 = sadd.s32 %s1830_s13, %s1259_s20 }
  0x13   : > { %s171_s22 = sadd.s32 1, %s1818_s10  ;;  %s2324_s18 = smov (%p35_p0, %s34_s18), 0 }
  0x14   : > { %2286 = sst [smem:[#allocation18_spill]] %s2324_s18  ;;  %s2326_s19 = smov (!%p35_p0, %s37_s19), %s1834_s14 }
  0x15   : > { %p181_p1 = scmp.ne.s32.totalorder %s1818_s10, %s1814_s9  ;;  %p1960_p2 = scmp.eq.s32.totalorder %s1253_s16, 3 }
  0x16   : > { %p39_p3 = scmp.ge.s32.totalorder %s2326_s19, 2  ;;  %p187_p4 = scmp.ne.s32.totalorder %s1814_s9, %s1810_s30 }
  0x17   : > { %p1968_p5 = por %p1960_p2, %p181_p1  ;;  %p1972_p6 = scmp.eq.s32.totalorder %s1254_s17, 3 }
  0x18   : > { %s2328_s19 = smov (%p39_p3, %s2326_s19), 0  ;;  %s249_s16 = sadd.s32 1, %s1806_s29 }
  0x19   : > { %s2288_s24 = scalar_select %p1968_p5, 1, 0 }
  0x1a   : > { %2291 = sst [smem:[#allocation20_spill]] %s2328_s19  ;;  %p1980_p7 = por %p1972_p6, %p187_p4 }
  0x1b   : > { %2289 = sst [smem:[#allocation19_spill]] %s2288_s24  ;;  %s1260_s20 = sshll.u32 %s2328_s19, 1 }
  0x1c   : > { %s2292_s26 = scalar_select %p1980_p7, 1, 0 }
  0x1d   : > { %s246_s13 = ssub.s32 %s1834_s14, %s2328_s19  ;;  %s167_s17 = sadd.s32 %s1260_s20, %s2324_s18 }
  0x1e   : > { %2293 = sst [smem:[#allocation21_spill]] %s2292_s26  ;;  %p247_p8 = scmp.eq.s32.totalorder %s246_s13, 0 }
  0x1f   : > { %s168_s30 = ssub.s32 %s165_s21, %s167_s17  ;;  %p259_p9 = scmp.ne.s32.totalorder %s1806_s29, %s1802_s28 }
  0x20   : > { %p169_p10 = scmp.eq.s32.totalorder %s168_s30, 0  ;;  %p265_p11 = scmp.ne.s32.totalorder %s1802_s28, %s1798_s27 }
  0x21   : > { %s1994_s8 = scalar_select %p247_p8, %s1806_s29, %s249_s16  }
  0x22   : > { %s1997_s5 = scalar_select %p169_p10, %s1818_s10, %s171_s22  }
  0x23   : > { %2294 = sst [smem:[#allocation22_spill]] %s1994_s8  ;;  %p2001_p12 = por %p259_p9, %p1960_p2 }
  0x24   : > { %2295 = sst [smem:[#allocation23_spill]] %s1997_s5  ;;  %p2007_p13 = por %p265_p11, %p1972_p6 }
  0x25   : > { %p1263_p0 = scmp.ge.s32.totalorder %s1838_s15, 1  ;;  %p319_p1 = scmp.lt.s32.totalorder %s1838_s15, 5 }
  0x26   : > { %s2297_s26 = scalar_select %p2007_p13, 1, 0 }
  0x27   : > { %p320_p3 = pnand %p1263_p0, %p319_p1 }
  0x28   : > { %2298 = sst [smem:[#allocation24_spill]] %s2297_s26  ;;  %s2269_s30 = sand.u32 (!%p320_p3), 1, %s1814_s9  }
  0x29   : > { %323 = sbr.rel (%p320_p3) target bundleno = 1119 (0x45f), region = 40  ;;  %s2270_s13 = sand.u32 (!%p320_p3), 1, %s1802_s28  }
  0x2a   : > { %s2017_s21 = sshll.u32 (!%p320_p3), %s2269_s30, 2  ;;  %s2021_s22 = sshll.u32 (!%p320_p3), %s2270_s13, 2 }
  0x2b   : > { %s1266_s23 = sshll.u32 (!%p320_p3), %s1826_s12, 1  ;;  %p397_p2 = scmp.lt.s32.totalorder (!%p320_p3), %s1826_s12, 1 }
  0x2c   : > { %s2026_s25 = sadd.s32 (!%p320_p3), %s1822_s11, %s1266_s23  ;;  %s374_s15 = scalar_lea.vmem (!%p320_p3), [#allocation7], %s2021_s22 }
  0x2d   : > { %s1267_s16 = sshll.u32 (!%p320_p3), %s2026_s25, 4  ;;  %p1274_p6 = scmp.ne.s32.totalorder (!%p320_p3), %s1822_s11, 0 }
  0x2e   : > { %p378_p4 = scmp.lt.s32.totalorder (!%p320_p3), %s1267_s16, 63 }
  0x30   : > { %s398_s20 = scalar_select %p397_p2, %s1826_s12, 1 }
  0x31   : > { %s2330_s16 = smov (!%p378_p4, %s1267_s16), 63  ;;  %409 = sbr.rel (%p1274_p6) target bundleno = 56 (0x38), region = 44 }
  0x32   : > { %s1272_s17 = sshll.u32 %s398_s20, 2  ;;  %s1268_s19 = sshll.u32 %s2330_s16, 2  ;;  %vm410_vm0 = vcmask (!%p1274_p6), 3072   ;;  %vm413_vm1 = vcmask (!%p1274_p6), 257024   ;;  %v1840_v0 = vmov (!%p1274_p6), -inf   ;;  %v1841_v1 = vmov (!%p1274_p6), 0.0  }
  0x33   : > { %s2033_s30 = scalar_lea.vmem %s2256_s6, %s1272_s17  ;;  %s2038_s10 = scalar_lea.vmem %s2251_s1, %s1268_s19  ;;  %411 = vst.msk [vmem:[#allocation2] sm:$0xf] (!%p1274_p6), %vm410_vm0, %v1840_v0  ;;  %412 = vst.msk [vmem:[#allocation3] sm:$0xf] (!%p1274_p6), %vm410_vm0, %v1841_v1 }
  0x34   : > { %s2043_s29 = scalar_lea.vmem %s2252_s2, %s1268_s19  ;;  %s2048_s20 = scalar_lea.vmem %s2257_s7, %s1272_s17  ;;  %414 = vst.msk [vmem:[#allocation4] sm:$0xf] (!%p1274_p6), %vm413_vm1, %v1841_v1 }
  0x35   : > { %s355_s16 = scalar_lea.vmem [#allocation5], %s2017_s21 }
  0x38 PF: > { %v1664_v2 = vld [vmem:[%s2253_s3] sm:$0xff]   ;;  %v1665_v3 = vld [vmem:[%s2253_s3 + $0x8] sm:$0xff]   ;;  %vm487_vm2 = vcmask 261120   ;;  %v1668_v6 = vld [vmem:[%s2038_s10 + $0x10] sm:$0xff]   ;;  %v1842_v12 = vmov 0.0|0.0   ;;  %vm1843_vm3 = vmmov 0  }
  0x39   : > { %1390 = vmatprep.subr.bf16.mxu0 %v1664_v2  ;;  %v1666_v4 = vld [vmem:[%s2038_s10] sm:$0xff]   ;;  %v1667_v5 = vld [vmem:[%s2038_s10 + $0x8] sm:$0xff]   ;;  %v1669_v7 = vld [vmem:[%s2038_s10 + $0x18] sm:$0xff]   ;;  %v1844_v13 = vmov 0.0   ;;  %vm926_vm5 = vcmask 1043456   ;;  %v1845_v53 = vmov 0  }
  0x3a   : > { %1391 = vmatpush3.bf16.msra.mxu0 %v1664_v2  ;;  %1394 = vmatprep.mubr.msk.bf16.mxu0 %vm487_vm2, %v1666_v4  ;;  %v1670_v8 = vld [vmem:[%s2038_s10 + $0x20] sm:$0xff]   ;;  %v1671_v9 = vld [vmem:[%s2038_s10 + $0x28] sm:$0xff]   ;;  %v1672_v10 = vld [vmem:[%s2038_s10 + $0x30] sm:$0xff]   ;;  %vm948_vm6 = vcmask 3072   ;;  %vm1028_vm7 = vcmask 257024   ;;  %p1328_p8 = scmp.ne.s32.totalorder %s1822_s11, 1 }
  0x3b   : > { %1392 = vmatprep.subr.bf16.mxu0 %v1665_v3  ;;  %v1673_v11 = vld [vmem:[%s2038_s10 + $0x38] sm:$0xff]   ;;  %vm2080_vm4 = vmpackc.low %vm487_vm2, %vm487_vm2  ;;  %v802_v39 = vld [vmem:[%s2250_s0] sm:$0xf]  ;;  %1662 = vset.pattern.permute.xlu0 %v1845_v53 }
  0x3c   : > { %v1674_v40 = vld [vmem:[%s2254_s4] sm:$0xff]   ;;  %v1675_v41 = vld [vmem:[%s2254_s4 + $0x8] sm:$0xff]   ;;  %v1678_v44 = vld [vmem:[%s2043_s29 + $0x10] sm:$0xff]   ;;  %1663 = vset.pattern.permute.xlu1 %v1845_v53 }
  0x3d   : > { %v1676_v42 = vld [vmem:[%s2043_s29] sm:$0xff]   ;;  %1410 = vmatprep.subr.bf16.mxu1 %v1674_v40  ;;  %v1677_v43 = vld [vmem:[%s2043_s29 + $0x8] sm:$0xff]   ;;  %v1679_v45 = vld [vmem:[%s2043_s29 + $0x18] sm:$0xff]  }
  0x3e   : > { %1393 = vmatpush3.bf16.msra.mxu0 %v1665_v3  ;;  %1414 = vmatprep.mubr.msk.bf16.mxu1 %vm487_vm2, %v1676_v42  ;;  %v1680_v46 = vld [vmem:[%s2043_s29 + $0x20] sm:$0xff]   ;;  %v1681_v47 = vld [vmem:[%s2043_s29 + $0x28] sm:$0xff]   ;;  %v1682_v48 = vld [vmem:[%s2043_s29 + $0x30] sm:$0xff]  }
  0x3f   : > { %1500 = vmatprep.subr.bf16.mxu0 %v1842_v12  ;;  %1411 = vmatpush3.bf16.msra.mxu1 %v1674_v40  ;;  %v1683_v49 = vld [vmem:[%s2043_s29 + $0x38] sm:$0xff]  }
  0x40   : > { %1412 = vmatprep.subr.bf16.mxu1 %v1675_v41 }
  0x41   : > { %1395 = vmatmul.mubr.msk.bf16.vlgmr.msra.gmra.mrb[0].mxu0 %vm487_vm2, %v1667_v5 }
  0x42   : > { %1398 = vmatprep.mubr.msk.bf16.mxu0 %vm487_vm2, %v1668_v6 }
  0x43   : > { %1413 = vmatpush3.bf16.msra.mxu1 %v1675_v41 }
  0x44   : > { %1532 = vmatprep.subr.bf16.mxu1 %v1842_v12 }
  0x46   : > { %1415 = vmatmul.mubr.msk.bf16.vlgmr.msra.gmra.mrb[0].mxu1 %vm487_vm2, %v1677_v43 }
  0x47   : > { %1418 = vmatprep.mubr.msk.bf16.mxu1 %vm487_vm2, %v1678_v44 }
  0x49   : > { %1399 = vmatmul.mubr.msk.bf16.gmra.mrb[4].mxu0 %vm487_vm2, %v1669_v7 }
  0x4a   : > { %1402 = vmatprep.mubr.msk.bf16.mxu0 %vm487_vm2, %v1670_v8 }
  0x4e   : > { %1419 = vmatmul.mubr.msk.bf16.gmra.mrb[4].mxu1 %vm487_vm2, %v1679_v45 }
  0x4f   : > { %1422 = vmatprep.mubr.msk.bf16.mxu1 %vm487_vm2, %v1680_v46 }
  0x51   : > { %1403 = vmatmul.mubr.msk.bf16.gmra.mrb[8].mxu0 %vm487_vm2, %v1671_v9 }
  0x52   : > { %1406 = vmatprep.mubr.msk.bf16.mxu0 %vm487_vm2, %v1672_v10 }
  0x56   : > { %1423 = vmatmul.mubr.msk.bf16.gmra.mrb[8].mxu1 %vm487_vm2, %v1681_v47 }
  0x57   : > { %1426 = vmatprep.mubr.msk.bf16.mxu1 %vm487_vm2, %v1682_v48 }
  0x59   : > { %1407 = vmatmul.mubr.msk.bf16.gmra.mrb[12].mxu0 %vm487_vm2, %v1673_v11 }
  0x5a   : > { %1462 = vmatprep.mubr.msk.f32.mxu0 %vm1843_vm3, %v1844_v13 }
  0x5e   : > { %1427 = vmatmul.mubr.msk.bf16.gmra.mrb[12].mxu1 %vm487_vm2, %v1683_v49 }
  0x5f   : > { %1497 = vmatprep.mubr.msk.f32.mxu1 %vm1843_vm3, %v1844_v13 }
 0x114   : > { %v1396_v14 = vpop.f32.mrb[0].mxu0 }
 0x115   : > { %v546_v15 = vpop.f32.mrb[1].mxu0 }
 0x116   : > { %v1397_v16 = vpop.f32.mrb[2].mxu0 }
 0x117   : > { %v1505_v17 = vpack.c.bf16 %v1397_v16, %v1396_v14  ;;  %v549_v18 = vpop.f32.mrb[3].mxu0 }
 0x118   : > { %v1501_v20 = vpack.c.bf16 %v549_v18, %v546_v15  ;;  %v925_v15 = vld [vmem:[#allocation2] sm:$0xf] }
 0x119   : > { %v1416_v54 = vpop.f32.mrb[0].mxu1 }
 0x11a   : > { %1503 = vmatpush3.bf16.xpose.msk.msra.mxu0 %vm2080_vm4, %v1501_v20  ;;  %v739_v55 = vpop.f32.mrb[1].mxu1 }
 0x11b   : > { %1504 = vmatprep.subr.bf16.mxu0 %v1842_v12  ;;  %v1417_v56 = vpop.f32.mrb[2].mxu1 }
 0x11c   : > { %v1400_v21 = vpop.f32.mrb[4].mxu0  ;;  %v1536_v57 = vpack.c.bf16 %v1417_v56, %v1416_v54  ;;  %v742_v58 = vpop.f32.mrb[3].mxu1 }
 0x11d   : > { %v562_v22 = vpop.f32.mrb[5].mxu0  ;;  %v1533_v59 = vpack.c.bf16 %v742_v58, %v739_v55 }
 0x11e   : > { %v1401_v23 = vpop.f32.mrb[6].mxu0 }
 0x11f   : > { %v1513_v24 = vpack.c.bf16 %v1401_v23, %v1400_v21  ;;  %v565_v25 = vpop.f32.mrb[7].mxu0  ;;  %1534 = vmatpush3.bf16.msra.mxu1 %v1533_v59 }
 0x120   : > { %v1509_v26 = vpack.c.bf16 %v565_v25, %v562_v22  ;;  %1535 = vmatprep.subr.bf16.mxu1 %v1842_v12  ;;  %v942_v25 = vld [vmem:[#allocation3] sm:$0xf] }
 0x121   : > { %v1420_v60 = vpop.f32.mrb[4].mxu1 }
 0x122   : > { %1507 = vmatpush3.bf16.xpose.msk.msra.mxu0 %vm2080_vm4, %v1505_v17  ;;  %v755_v61 = vpop.f32.mrb[5].mxu1 }
 0x123   : > { %1508 = vmatprep.subr.bf16.mxu0 %v1842_v12  ;;  %v1421_v62 = vpop.f32.mrb[6].mxu1  ;;  %1537 = vmatpush3.bf16.msra.mxu1 %v1536_v57 }
 0x124   : > { %v1404_v27 = vpop.f32.mrb[8].mxu0  ;;  %v1542_v63 = vpack.c.bf16 %v1421_v62, %v1420_v60  ;;  %v758_v0 = vpop.f32.mrb[7].mxu1  ;;  %1538 = vmatprep.subr.bf16.mxu1 %v1842_v12 }
 0x125   : > { %v578_v28 = vpop.f32.mrb[9].mxu0  ;;  %v1539_v1 = vpack.c.bf16 %v758_v0, %v755_v61 }
 0x126   : > { %v1405_v29 = vpop.f32.mrb[10].mxu0 }
 0x127   : > { %v1521_v30 = vpack.c.bf16 %v1405_v29, %v1404_v27  ;;  %v581_v31 = vpop.f32.mrb[11].mxu0  ;;  %1540 = vmatpush3.bf16.msra.mxu1 %v1539_v1  ;;  %v950_v29 = vld [vmem:[#allocation4] sm:$0xf] }
 0x128   : > { %v1517_v32 = vpack.c.bf16 %v581_v31, %v578_v28  ;;  %1541 = vmatprep.subr.bf16.mxu1 %v1842_v12 }
 0x129   : > { %v1424_v2 = vpop.f32.mrb[8].mxu1 }
 0x12a   : > { %1511 = vmatpush3.bf16.xpose.msk.msra.mxu0 %vm2080_vm4, %v1509_v26  ;;  %v771_v3 = vpop.f32.mrb[9].mxu1 }
 0x12b   : > { %1512 = vmatprep.subr.bf16.mxu0 %v1842_v12  ;;  %v1425_v4 = vpop.f32.mrb[10].mxu1  ;;  %1543 = vmatpush3.bf16.msra.mxu1 %v1542_v63 }
 0x12c   : > { %v1408_v33 = vpop.f32.mrb[12].mxu0  ;;  %v1548_v5 = vpack.c.bf16 %v1425_v4, %v1424_v2  ;;  %v774_v6 = vpop.f32.mrb[11].mxu1  ;;  %1544 = vmatprep.subr.bf16.mxu1 %v1842_v12 }
 0x12d   : > { %v594_v34 = vpop.f32.mrb[13].mxu0  ;;  %v1545_v7 = vpack.c.bf16 %v774_v6, %v771_v3 }
 0x12e   : > { %v1409_v35 = vpop.f32.mrb[14].mxu0 }
 0x12f   : > { %v1529_v36 = vpack.c.bf16 %v1409_v35, %v1408_v33  ;;  %v597_v37 = vpop.f32.mrb[15].mxu0  ;;  %1546 = vmatpush3.bf16.msra.mxu1 %v1545_v7 }
 0x130   : > { %v1525_v38 = vpack.c.bf16 %v597_v37, %v594_v34  ;;  %1547 = vmatprep.subr.bf16.mxu1 %v1842_v12 }
 0x131   : > { %v1428_v8 = vpop.f32.mrb[12].mxu1 }
 0x132   : > { %1515 = vmatpush3.bf16.xpose.msk.msra.mxu0 %vm2080_vm4, %v1513_v24  ;;  %v787_v9 = vpop.f32.mrb[13].mxu1 }
 0x133   : > { %1516 = vmatprep.subr.bf16.mxu0 %v1842_v12  ;;  %v1429_v10 = vpop.f32.mrb[14].mxu1  ;;  %1549 = vmatpush3.bf16.msra.mxu1 %v1548_v5 }
 0x134   : > { %v1554_v11 = vpack.c.bf16 %v1429_v10, %v1428_v8  ;;  %v790_v13 = vpop.f32.mrb[15].mxu1  ;;  %1550 = vmatprep.subr.bf16.mxu1 %v1842_v12 }
 0x135   : > { %v1551_v14 = vpack.c.bf16 %v790_v13, %v787_v9 }
 0x137   : > { %1552 = vmatpush3.bf16.msra.mxu1 %v1551_v14 }
 0x138   : > { %1553 = vmatprep.subr.bf16.mxu1 %v1842_v12 }
 0x13a   : > { %1519 = vmatpush3.bf16.xpose.msk.msra.mxu0 %vm2080_vm4, %v1517_v32 }
 0x13b   : > { %1520 = vmatprep.subr.bf16.mxu0 %v1842_v12  ;;  %1555 = vmatpush3.bf16.msra.mxu1 %v1554_v11 }
 0x142   : > { %1523 = vmatpush3.bf16.xpose.msk.msra.mxu0 %vm2080_vm4, %v1521_v30 }
 0x143   : > { %1524 = vmatprep.subr.bf16.mxu0 %v1842_v12 }
 0x14a   : > { %1527 = vmatpush3.bf16.xpose.msk.msra.mxu0 %vm2080_vm4, %v1525_v38 }
 0x14b   : > { %1528 = vmatprep.subr.bf16.mxu0 %v1842_v12 }
 0x152   : > { %1531 = vmatpush3.bf16.xpose.msk.msra.mxu0 %vm2080_vm4, %v1529_v36 }
 0x159   : > { %1463 = vmatmul.mubr.msk.f32.vlgmr.msra.gmra.mrb[16].mxu0 %vm487_vm2, %v802_v39 }
 0x22c   : > { %v920_v50 = vpop.f32.mrb[16].mxu0 }
 0x22d   : > { %924 = vst [vmem:[%s355_s16] sm:$0xf] %v920_v50  ;;  %v1464_v51 = vpop.f32.mrb[17].mxu0  ;;  %v927_v52 = vsel %vm926_vm5, %v920_v50, -inf }
 0x22e   : > { %928 = vmax.xlane.f32.xlu0 %v927_v52 }
 0x2bb   : > { %v929_v16 = vpop.xlane.xlu0 %928 }
 0x2bc   : > { %v930_v17 = vmax.f32 %v925_v15, %v929_v16 }
 0x2be   : > { %v931_v18 = vsub.f32 %v925_v15, %v930_v17  ;;  %1030 = vst.msk [vmem:[#allocation2] sm:$0xf] %vm948_vm6, %v930_v17  ;;  %936 = vperm.xlu0 %1662, %v930_v17  }
 0x2c0   : > { %v932_v24 = vmul.f32 1.442695, %v931_v18 }
 0x2c5   : > { %v1035_v35 = vld [vmem:[#allocation2] sm:$0xf] (!%p1328_p8) }
 0x2c6   : > { %1036 = vst.msk [vmem:[%s2033_s30] sm:$0xf] (!%p1328_p8), %vm948_vm6, %v1035_v35 }
 0x33d   : > { %v937_v19 = vpop.permute.xlu0 %936 }
 0x33e   : > { %v939_v20 = vsub.f32 %v920_v50, %v937_v19 }
 0x340   : > { %v940_v21 = vmul.f32 1.442695, %v939_v20 }
 0x342   : > { %1684 = vpow2.f32 %v940_v21 }
 0x343   : > { %1686 = vpow2.f32 %v932_v24 }
 0x34c   : > { %v1685_v22 = vpop.eup %1684 }
 0x34d   : > { %1498 = vmatmul.mubr.f32.vlgmr.msra.gmra.mrb[16].mxu1 %v1685_v22  ;;  %v944_v23 = vsel %vm926_vm5, %v1685_v22, 0.0  ;;  %v1687_v12 = vpop.eup %1686 }
 0x34e   : > { %945 = vadd.xlane.f32.xlu1 %v944_v23  ;;  %v943_v26 = vmul.f32 %v1687_v12, %v942_v25 }
 0x35f   : > { %953 = vperm.xlu1 %1663, %v1687_v12  }
 0x3db   : > { %v946_v27 = vpop.xlane.xlu1 %945 }
 0x3dc   : > { %v947_v28 = vadd.f32 %v946_v27, %v943_v26 }
 0x3de   : > { %949 = vst.msk [vmem:[#allocation3] sm:$0xf] %vm948_vm6, %v947_v28 }
 0x3df   : > { %v954_v30 = vpop.permute.xlu1 %953 }
 0x3e0   : > { %v956_v31 = vmul.f32 %v954_v30, %v950_v29 }
 0x3e5   : > { %v1037_v36 = vld [vmem:[#allocation3] sm:$0xf] (!%p1328_p8) }
 0x3e6   : > { %1038 = vst.msk [vmem:[%s2048_s20] sm:$0xf] (!%p1328_p8), %vm948_vm6, %v1037_v36 }
 0x41d   : > { %1034 = sbr.rel (%p1328_p8) target bundleno = 1068 (0x42c), region = 48 }
 0x420   : > { %v1023_v32 = vpop.f32.mrb[16].mxu1 }
 0x421   : > { %v1027_v33 = vadd.f32 %v1023_v32, %v956_v31  ;;  %v1499_v34 = vpop.f32.mrb[17].mxu1 }
 0x423   : > { %1029 = vst.msk [vmem:[#allocation4] sm:$0xf] %vm1028_vm7, %v1027_v33 }
 0x42a   : > { %v1039_v37 = vld [vmem:[#allocation4] sm:$0xf] }
 0x42b   : > { %1040 = vst.msk [vmem:[%s374_s15] sm:$0xf] %vm1028_vm7, %v1039_v37 }
 0x42c PF: > { %s1332_s23 = sshll.u32 %s2026_s25, 6  ;;  %s2302_s8 = sld [smem:[#allocation25_spill]] }
 0x42d   : > { %s1070_s14 = sshll.u32 %s355_s16, 4  ;;  %s2303_s10 = sand.u32 1, %s1814_s9   ;;  %s1071_s14 = int_to_ptr.vmem [resolvable:$true] %s1070_s14 }
 0x42e   : > { %s1042_s30 = scalar_lea.sflag [#allocation6], %s2303_s10  ;;  %s1688_s18 = scalar_lea.vmem %s1071_s14, 64 }
 0x42f   : > { %p1689_p9 = scmp.ne.s32.totalorder %s1071_s14, %s1688_s18  ;;  %s1846_s20 = smov [#allocation5]  }
 0x430   : > { %s1692_s19 = sshll.u32 %s1846_s20, 4  ;;  %s1693_s19 = int_to_ptr.vmem [resolvable:$false] %s1692_s19 }
 0x431   : > { %p1690_p10 = pnand %p1689_p9, %p1968_p5  ;;  %s1694_s26 = scalar_lea.vmem %s1693_s19, 128 }
 0x432   : > { %s2160_s27 = scalar_lea.hbm %s2302_s8, %s1332_s23  ;;  %p1695_p0 = scmp.lt.s32.totalorder %s1071_s14, %s1693_s19 }
 0x433   : > { %p1691_p11 = pneg %p1690_p10  ;;  %p1696_p1 = scmp.lt.s32.totalorder %s1694_s26, %s1688_s18 }
 0x435   : > { %p1697_p3 = por %p1696_p1, %p1695_p0 }
 0x437   : > { %p1698_p2 = pnand %p1697_p3, %p1691_p11 }
 0x439   : > { %1701 = shalt.err (!%p1698_p2)
}
 0x43a   : > { %s1702_s21 = scalar_lea.hbm %s2160_s27, 64  ;;  %s1706_s13 = scalar_lea.hbm %s2302_s8, 256 }
 0x43b   : > { %p1703_p4 = scmp.ne.s32.totalorder %s2160_s27, %s1702_s21  ;;  %p1707_p9 = scmp.lt.u32.totalorder %s2160_s27, %s2302_s8 }
 0x43c   : > { %p1708_p10 = scmp.lt.u32.totalorder %s1706_s13, %s1702_s21  ;;  %p1710_p0 = scmp.lt.u32.totalorder %s1702_s21, %s2160_s27 }
 0x43d   : > { %p1704_p6 = pnand %p1703_p4, %p1968_p5 }
 0x43e   : > { %p1709_p11 = por %p1708_p10, %p1707_p9 }
 0x43f   : > { %p1705_p8 = pneg %p1704_p6 }
 0x440   : > { %p1711_p1 = por %p1710_p0, %p1709_p11 }
 0x442   : > { %p1712_p3 = pnand %p1711_p1, %p1705_p8 }
 0x444   : > { %1715 = shalt.err (!%p1712_p3)
}
 0x445   : > { %1556 = dma.vmem_to_hbm [thread:$0]  (%p1968_p5), %s1071_s14, 64, %s2160_s27, %s1042_s30  }
 0x446   : > { %s1333_s11 = sshll.u32 %s1826_s12, 6  ;;  %s1089_s5 = sshll.u32 %s374_s15, 4  ;;  %s1090_s5 = int_to_ptr.vmem [resolvable:$true] %s1089_s5 }
 0x447   : > { %s2304_s20 = sld [smem:[#allocation26_spill]]  ;;  %s2305_s26 = sand.u32 1, %s1802_s28  }
 0x448   : > { %s1055_s21 = scalar_lea.sflag [#allocation8], %s2305_s26  ;;  %s1716_s25 = scalar_lea.vmem %s1090_s5, 64 }
 0x449   : > { %p1717_p2 = scmp.ne.s32.totalorder %s1090_s5, %s1716_s25  ;;  %s1847_s29 = smov [#allocation7]  }
 0x44a   : > { %s1720_s16 = sshll.u32 %s1847_s29, 4  ;;  %s1721_s16 = int_to_ptr.vmem [resolvable:$false] %s1720_s16 }
 0x44b   : > { %p1718_p4 = pnand %p1717_p2, %p2001_p12  ;;  %s1722_s27 = scalar_lea.vmem %s1721_s16, 128 }
 0x44c   : > { %p1723_p5 = scmp.lt.s32.totalorder %s1090_s5, %s1721_s16  ;;  %p1724_p8 = scmp.lt.s32.totalorder %s1722_s27, %s1716_s25 }
 0x44d   : > { %s2189_s19 = scalar_lea.hbm %s2304_s20, %s1333_s11  ;;  %p1719_p6 = pneg %p1718_p4 }
 0x44e   : > { %p1725_p9 = por %p1724_p8, %p1723_p5 }
 0x450   : > { %p1726_p10 = pnand %p1725_p9, %p1719_p6 }
 0x452   : > { %1729 = shalt.err (!%p1726_p10)
}
 0x453   : > { %s1730_s12 = scalar_lea.hbm %s2189_s19, 64  ;;  %s1734_s14 = scalar_lea.hbm %s2304_s20, 128 }
 0x454   : > { %p1731_p11 = scmp.ne.s32.totalorder %s2189_s19, %s1730_s12  ;;  %p1735_p3 = scmp.lt.u32.totalorder %s2189_s19, %s2304_s20 }
 0x455   : > { %p1736_p2 = scmp.lt.u32.totalorder %s1734_s14, %s1730_s12  ;;  %p1738_p6 = scmp.lt.u32.totalorder %s1730_s12, %s2189_s19 }
 0x456   : > { %p1732_p0 = pnand %p1731_p11, %p2001_p12 }
 0x457   : > { %p1737_p4 = por %p1736_p2, %p1735_p3 }
 0x458   : > { %p1733_p1 = pneg %p1732_p0 }
 0x459   : > { %p1739_p5 = por %p1738_p6, %p1737_p4 }
 0x45b   : > { %p1740_p8 = pnand %p1739_p5, %p1733_p1 }
 0x45d   : > { %1743 = shalt.err (!%p1740_p8)
}
 0x45e   : > { %1557 = dma.vmem_to_hbm [thread:$0]  (%p2001_p12), %s1090_s5, 64, %s2189_s19, %s1055_s21  }
 0x45f PF: > { %s2306_s17 = sld [smem:[#allocation17_spill]]  ;;  %s2307_s23 = sld [smem:[#allocation13_spill]] }
 0x465   : > { %p1567_p9 = scmp.ge.s32.totalorder %s2306_s17, 2  ;;  %s1101_s10 = sand.u32 1, %s2307_s23  }
 0x466   : > { %s1102_s18 = scalar_lea.sflag [#allocation6], %s1101_s10 }
 0x467   : > { %p1561_p10 = pnand %p1567_p9, %p1980_p7 }
 0x469   : > { %1789 = dma.done.wait (!%p1561_p10), %s1102_s18, 64  }
 0x46a   : > { %1791 = vsyncadd (!%p1561_p10), %s1102_s18, 4294967232  ;;  %s2309_s26 = sld [smem:[#allocation11_spill]]  ;;  %p1564_p11 = pnand %p1567_p9, %p2007_p13 }
 0x470   : > { %s1124_s29 = sand.u32 1, %s2309_s26  }
 0x471   : > { %s1125_s16 = scalar_lea.sflag [#allocation8], %s1124_s29 }
 0x472   : > { %1793 = dma.done.wait (!%p1564_p11), %s1125_s16, 64  }
 0x473   : > { %1795 = vsyncadd (!%p1564_p11), %s1125_s16, 4294967232  ;;  %s25_s15 = sadd.s32 1, %s2306_s17   ;;  %s2311_s24 = sld [smem:[#allocation12_spill]] }
 0x474   : > { %p22_p12 = scmp.ge.s32.totalorder %s25_s15, 6   ;;  %s2312_s29 = sld [smem:[#allocation22_spill]] }
 0x475   : > { %s2313_s5 = sld [smem:[#allocation14_spill]]  ;;  %s2314_s10 = sld [smem:[#allocation23_spill]] }
 0x476   : > { %s2315_s11 = sld [smem:[#allocation15_spill]]  ;;  %s2316_s12 = sld [smem:[#allocation16_spill]] }
 0x477   : > { %s2317_s13 = sld [smem:[#allocation18_spill]]  ;;  %s2318_s14 = sld [smem:[#allocation20_spill]] }
 0x478   : > { %s2319_s27 = smov %s1802_s28  ;;  %s2321_s30 = smov %s1814_s9 }
 0x479   : > { %s2320_s28 = smov %s2311_s24  ;;  %24 = sbr.rel (!%p22_p12) target bundleno = 12 (0xc), region = 127 }
 0x47b   : > { %s2322_s9 = smov %s2313_s5 }
 0x480   :  { %1130 = vsyncpa [#allocation6], 1 }
 0x481   :  { %1132 = vsyncpa [#allocation6 + $0x1], 1 }
 0x482   :  { %1133 = vsyncpa [#allocation8], 1 }
 0x483   :  { %1135 = vsyncpa [#allocation8 + $0x1], 1 }

// kernel: tpu_custom_call.1
= control target key start
LH: loop header
LB: loop body
LE: loop exit
PB: predicated region body
PF: predicated region fallthrough
CT: control target
= control target key end

     0   :  { %s2250_s0 = inlined_call_operand.vmem [shape: f32[4,32], index: 0, kind: input, shape index: {}]   ;;  %s2251_s1 = inlined_call_operand.vmem [shape: bf16[512,32], index: 1, kind: input, shape index: {}]   ;;  %s2252_s2 = inlined_call_operand.vmem [shape: bf16[512,32], index: 2, kind: input, shape index: {}]   ;;  %s2253_s3 = inlined_call_operand.vmem [shape: bf16[32,32], index: 3, kind: input, shape index: {}]   ;;  %s2254_s4 = inlined_call_operand.vmem [shape: bf16[32,32], index: 4, kind: input, shape index: {}]   ;;  %s2255_s5 = inlined_call_operand.hbm [shape: f32[4,512], index: 5, kind: output, shape index: {0}]   ;;  %s2256_s6 = inlined_call_operand.vmem [shape: f32[2,4,1], index: 6, kind: output, shape index: {1}]   ;;  %s2257_s7 = inlined_call_operand.vmem [shape: f32[2,4,1], index: 7, kind: output, shape index: {2}]   ;;  %s2258_s8 = inlined_call_operand.hbm [shape: f32[2,4,32], index: 8, kind: output, shape index: {3}]  }
   0x1   :  { %2277 = sst [smem:[#allocation25_spill]] %s2255_s5 }
   0x2   :  { %2278 = sst [smem:[#allocation26_spill]] %s2258_s8 }
   0x3   :  { %14 = vsyncpa [#allocation6], 0 }
   0x4   :  { %16 = vsyncpa [#allocation6 + $0x1], 0 }
   0x5   :  { %17 = vsyncpa [#allocation8], 0 }
   0x6   :  { %19 = vsyncpa [#allocation8 + $0x1], 0  ;;  %s1893_s27 = smov 0   ;;  %s1895_s28 = smov 0  }
   0x7   :  { %s1897_s29 = smov 0   ;;  %s1899_s30 = smov 0  }
   0x8   :  { %s1901_s9 = smov 0   ;;  %s1903_s10 = smov 0  }
   0x9   :  { %s1905_s11 = smov 0   ;;  %s1907_s12 = smov 0  }
   0xa   :  { %s1909_s13 = smov 0   ;;  %s1911_s14 = smov 0  }
   0xb   :  { %s1913_s15 = smov 0  }
   0xc LB: > { %2279 = sst [smem:[#allocation11_spill]] %s1798_s27  ;;  %s1253_s16 = sadd.s32 4294967295, %s1838_s15   ;;  %s1838_s15 = sphi %s1913_s15, %s25_s15   ;;  %s1834_s14 = sphi %s1911_s14, %s2318_s14   ;;  %s1830_s13 = sphi %s1909_s13, %s2317_s13   ;;  %s1826_s12 = sphi %s1907_s12, %s2316_s12   ;;  %s1822_s11 = sphi %s1905_s11, %s2315_s11   ;;  %s1818_s10 = sphi %s1903_s10, %s2314_s10   ;;  %s1814_s9 = sphi %s1901_s9, %s2322_s9   ;;  %s1810_s30 = sphi %s1899_s30, %s2321_s30   ;;  %s1806_s29 = sphi %s1897_s29, %s2312_s29   ;;  %s1802_s28 = sphi %s1895_s28, %s2320_s28   ;;  %s1798_s27 = sphi %s1893_s27, %s2319_s27  }
   0xd   : > { %2280 = sst [smem:[#allocation12_spill]] %s1806_s29  ;;  %s1254_s17 = sadd.s32 4294967294, %s1838_s15  }
   0xe   : > { %2281 = sst [smem:[#allocation13_spill]] %s1810_s30  ;;  %s34_s18 = sadd.s32 1, %s1830_s13 }
   0xf   : > { %2282 = sst [smem:[#allocation14_spill]] %s1818_s10  ;;  %s37_s19 = sadd.s32 1, %s1834_s14 }
  0x10   : > { %2283 = sst [smem:[#allocation15_spill]] %s1830_s13  ;;  %p35_p0 = scmp.ge.s32.totalorder %s34_s18, 2 }
  0x11   : > { %2284 = sst [smem:[#allocation16_spill]] %s1834_s14  ;;  %s1259_s20 = sshll.u32 %s1834_s14, 1 }
  0x12   : > { %2285 = sst [smem:[#allocation17_spill]] %s1838_s15  ;;  %s165_s21 = sadd.s32 %s1830_s13, %s1259_s20 }
  0x13   : > { %s171_s22 = sadd.s32 1, %s1818_s10  ;;  %s2324_s18 = smov (%p35_p0, %s34_s18), 0 }
  0x14   : > { %2286 = sst [smem:[#allocation18_spill]] %s2324_s18  ;;  %s2326_s19 = smov (!%p35_p0, %s37_s19), %s1834_s14 }
  0x15   : > { %p181_p1 = scmp.ne.s32.totalorder %s1818_s10, %s1814_s9  ;;  %p1960_p2 = scmp.eq.s32.totalorder %s1253_s16, 3 }
  0x16   : > { %p39_p3 = scmp.ge.s32.totalorder %s2326_s19, 2  ;;  %p187_p4 = scmp.ne.s32.totalorder %s1814_s9, %s1810_s30 }
  0x17   : > { %p1968_p5 = por %p1960_p2, %p181_p1  ;;  %p1972_p6 = scmp.eq.s32.totalorder %s1254_s17, 3 }
  0x18   : > { %s2328_s19 = smov (%p39_p3, %s2326_s19), 0  ;;  %s249_s16 = sadd.s32 1, %s1806_s29 }
  0x19   : > { %s2288_s24 = scalar_select %p1968_p5, 1, 0 }
  0x1a   : > { %2291 = sst [smem:[#allocation20_spill]] %s2328_s19  ;;  %p1980_p7 = por %p1972_p6, %p187_p4 }
  0x1b   : > { %2289 = sst [smem:[#allocation19_spill]] %s2288_s24  ;;  %s1260_s20 = sshll.u32 %s2328_s19, 1 }
  0x1c   : > { %s2292_s26 = scalar_select %p1980_p7, 1, 0 }
  0x1d   : > { %s246_s13 = ssub.s32 %s1834_s14, %s2328_s19  ;;  %s167_s17 = sadd.s32 %s1260_s20, %s2324_s18 }
  0x1e   : > { %2293 = sst [smem:[#allocation21_spill]] %s2292_s26  ;;  %p247_p8 = scmp.eq.s32.totalorder %s246_s13, 0 }
  0x1f   : > { %s168_s30 = ssub.s32 %s165_s21, %s167_s17  ;;  %p259_p9 = scmp.ne.s32.totalorder %s1806_s29, %s1802_s28 }
  0x20   : > { %p169_p10 = scmp.eq.s32.totalorder %s168_s30, 0  ;;  %p265_p11 = scmp.ne.s32.totalorder %s1802_s28, %s1798_s27 }
  0x21   : > { %s1994_s8 = scalar_select %p247_p8, %s1806_s29, %s249_s16  }
  0x22   : > { %s1997_s5 = scalar_select %p169_p10, %s1818_s10, %s171_s22  }
  0x23   : > { %2294 = sst [smem:[#allocation22_spill]] %s1994_s8  ;;  %p2001_p12 = por %p259_p9, %p1960_p2 }
  0x24   : > { %2295 = sst [smem:[#allocation23_spill]] %s1997_s5  ;;  %p2007_p13 = por %p265_p11, %p1972_p6 }
  0x25   : > { %p1263_p0 = scmp.ge.s32.totalorder %s1838_s15, 1  ;;  %p319_p1 = scmp.lt.s32.totalorder %s1838_s15, 5 }
  0x26   : > { %s2297_s26 = scalar_select %p2007_p13, 1, 0 }
  0x27   : > { %p320_p3 = pnand %p1263_p0, %p319_p1 }
  0x28   : > { %2298 = sst [smem:[#allocation24_spill]] %s2297_s26  ;;  %s2269_s30 = sand.u32 (!%p320_p3), 1, %s1814_s9  }
  0x29   : > { %323 = sbr.rel (%p320_p3) target bundleno = 1119 (0x45f), region = 40  ;;  %s2270_s13 = sand.u32 (!%p320_p3), 1, %s1802_s28  }
  0x2a   : > { %s2017_s21 = sshll.u32 (!%p320_p3), %s2269_s30, 2  ;;  %s2021_s22 = sshll.u32 (!%p320_p3), %s2270_s13, 2 }
  0x2b   : > { %s1266_s23 = sshll.u32 (!%p320_p3), %s1826_s12, 1  ;;  %p397_p2 = scmp.lt.s32.totalorder (!%p320_p3), %s1826_s12, 1 }
  0x2c   : > { %s2026_s25 = sadd.s32 (!%p320_p3), %s1822_s11, %s1266_s23  ;;  %s374_s15 = scalar_lea.vmem (!%p320_p3), [#allocation7], %s2021_s22 }
  0x2d   : > { %s1267_s16 = sshll.u32 (!%p320_p3), %s2026_s25, 4  ;;  %p1274_p6 = scmp.ne.s32.totalorder (!%p320_p3), %s1822_s11, 0 }
  0x2e   : > { %p378_p4 = scmp.lt.s32.totalorder (!%p320_p3), %s1267_s16, 63 }
  0x30   : > { %s398_s20 = scalar_select %p397_p2, %s1826_s12, 1 }
  0x31   : > { %s2330_s16 = smov (!%p378_p4, %s1267_s16), 63  ;;  %409 = sbr.rel (%p1274_p6) target bundleno = 56 (0x38), region = 44 }
  0x32   : > { %s1272_s17 = sshll.u32 %s398_s20, 2  ;;  %s1268_s19 = sshll.u32 %s2330_s16, 2  ;;  %vm410_vm0 = vcmask (!%p1274_p6), 3072   ;;  %vm413_vm1 = vcmask (!%p1274_p6), 257024   ;;  %v1840_v0 = vmov (!%p1274_p6), -inf   ;;  %v1841_v1 = vmov (!%p1274_p6), 0.0  }
  0x33   : > { %s2033_s30 = scalar_lea.vmem %s2256_s6, %s1272_s17  ;;  %s2038_s10 = scalar_lea.vmem %s2251_s1, %s1268_s19  ;;  %411 = vst.msk [vmem:[#allocation2] sm:$0xf] (!%p1274_p6), %vm410_vm0, %v1840_v0  ;;  %412 = vst.msk [vmem:[#allocation3] sm:$0xf] (!%p1274_p6), %vm410_vm0, %v1841_v1 }
  0x34   : > { %s2043_s29 = scalar_lea.vmem %s2252_s2, %s1268_s19  ;;  %s2048_s20 = scalar_lea.vmem %s2257_s7, %s1272_s17  ;;  %414 = vst.msk [vmem:[#allocation4] sm:$0xf] (!%p1274_p6), %vm413_vm1, %v1841_v1 }
  0x35   : > { %s355_s16 = scalar_lea.vmem [#allocation5], %s2017_s21 }
  0x38 PF: > { %v1664_v2 = vld [vmem:[%s2253_s3] sm:$0xff]   ;;  %v1665_v3 = vld [vmem:[%s2253_s3 + $0x8] sm:$0xff]   ;;  %vm487_vm2 = vcmask 261120   ;;  %v1668_v6 = vld [vmem:[%s2038_s10 + $0x10] sm:$0xff]   ;;  %v1842_v12 = vmov 0.0|0.0   ;;  %vm1843_vm3 = vmmov 0  }
  0x39   : > { %1390 = vmatprep.subr.bf16.mxu0 %v1664_v2  ;;  %v1666_v4 = vld [vmem:[%s2038_s10] sm:$0xff]   ;;  %v1667_v5 = vld [vmem:[%s2038_s10 + $0x8] sm:$0xff]   ;;  %v1669_v7 = vld [vmem:[%s2038_s10 + $0x18] sm:$0xff]   ;;  %v1844_v13 = vmov 0.0   ;;  %vm926_vm5 = vcmask 1043456   ;;  %v1845_v53 = vmov 0  }
  0x3a   : > { %1391 = vmatpush3.bf16.msra.mxu0 %v1664_v2  ;;  %1394 = vmatprep.mubr.msk.bf16.mxu0 %vm487_vm2, %v1666_v4  ;;  %v1670_v8 = vld [vmem:[%s2038_s10 + $0x20] sm:$0xff]   ;;  %v1671_v9 = vld [vmem:[%s2038_s10 + $0x28] sm:$0xff]   ;;  %v1672_v10 = vld [vmem:[%s2038_s10 + $0x30] sm:$0xff]   ;;  %vm948_vm6 = vcmask 3072   ;;  %vm1028_vm7 = vcmask 257024   ;;  %p1328_p8 = scmp.ne.s32.totalorder %s1822_s11, 1 }
  0x3b   : > { %1392 = vmatprep.subr.bf16.mxu0 %v1665_v3  ;;  %v1673_v11 = vld [vmem:[%s2038_s10 + $0x38] sm:$0xff]   ;;  %vm2080_vm4 = vmpackc.low %vm487_vm2, %vm487_vm2  ;;  %v802_v39 = vld [vmem:[%s2250_s0] sm:$0xf]  ;;  %1662 = vset.pattern.permute.xlu0 %v1845_v53 }
  0x3c   : > { %v1674_v40 = vld [vmem:[%s2254_s4] sm:$0xff]   ;;  %v1675_v41 = vld [vmem:[%s2254_s4 + $0x8] sm:$0xff]   ;;  %v1678_v44 = vld [vmem:[%s2043_s29 + $0x10] sm:$0xff]   ;;  %1663 = vset.pattern.permute.xlu1 %v1845_v53 }
  0x3d   : > { %v1676_v42 = vld [vmem:[%s2043_s29] sm:$0xff]   ;;  %1410 = vmatprep.subr.bf16.mxu1 %v1674_v40  ;;  %v1677_v43 = vld [vmem:[%s2043_s29 + $0x8] sm:$0xff]   ;;  %v1679_v45 = vld [vmem:[%s2043_s29 + $0x18] sm:$0xff]  }
  0x3e   : > { %1393 = vmatpush3.bf16.msra.mxu0 %v1665_v3  ;;  %1414 = vmatprep.mubr.msk.bf16.mxu1 %vm487_vm2, %v1676_v42  ;;  %v1680_v46 = vld [vmem:[%s2043_s29 + $0x20] sm:$0xff]   ;;  %v1681_v47 = vld [vmem:[%s2043_s29 + $0x28] sm:$0xff]   ;;  %v1682_v48 = vld [vmem:[%s2043_s29 + $0x30] sm:$0xff]  }
  0x3f   : > { %1500 = vmatprep.subr.bf16.mxu0 %v1842_v12  ;;  %1411 = vmatpush3.bf16.msra.mxu1 %v1674_v40  ;;  %v1683_v49 = vld [vmem:[%s2043_s29 + $0x38] sm:$0xff]  }
  0x40   : > { %1412 = vmatprep.subr.bf16.mxu1 %v1675_v41 }
  0x41   : > { %1395 = vmatmul.mubr.msk.bf16.vlgmr.msra.gmra.mrb[0].mxu0 %vm487_vm2, %v1667_v5 }
  0x42   : > { %1398 = vmatprep.mubr.msk.bf16.mxu0 %vm487_vm2, %v1668_v6 }
  0x43   : > { %1413 = vmatpush3.bf16.msra.mxu1 %v1675_v41 }
  0x44   : > { %1532 = vmatprep.subr.bf16.mxu1 %v1842_v12 }
  0x46   : > { %1415 = vmatmul.mubr.msk.bf16.vlgmr.msra.gmra.mrb[0].mxu1 %vm487_vm2, %v1677_v43 }
  0x47   : > { %1418 = vmatprep.mubr.msk.bf16.mxu1 %vm487_vm2, %v1678_v44 }
  0x49   : > { %1399 = vmatmul.mubr.msk.bf16.gmra.mrb[4].mxu0 %vm487_vm2, %v1669_v7 }
  0x4a   : > { %1402 = vmatprep.mubr.msk.bf16.mxu0 %vm487_vm2, %v1670_v8 }
  0x4e   : > { %1419 = vmatmul.mubr.msk.bf16.gmra.mrb[4].mxu1 %vm487_vm2, %v1679_v45 }
  0x4f   : > { %1422 = vmatprep.mubr.msk.bf16.mxu1 %vm487_vm2, %v1680_v46 }
  0x51   : > { %1403 = vmatmul.mubr.msk.bf16.gmra.mrb[8].mxu0 %vm487_vm2, %v1671_v9 }
  0x52   : > { %1406 = vmatprep.mubr.msk.bf16.mxu0 %vm487_vm2, %v1672_v10 }
  0x56   : > { %1423 = vmatmul.mubr.msk.bf16.gmra.mrb[8].mxu1 %vm487_vm2, %v1681_v47 }
  0x57   : > { %1426 = vmatprep.mubr.msk.bf16.mxu1 %vm487_vm2, %v1682_v48 }
  0x59   : > { %1407 = vmatmul.mubr.msk.bf16.gmra.mrb[12].mxu0 %vm487_vm2, %v1673_v11 }
  0x5a   : > { %1462 = vmatprep.mubr.msk.f32.mxu0 %vm1843_vm3, %v1844_v13 }
  0x5e   : > { %1427 = vmatmul.mubr.msk.bf16.gmra.mrb[12].mxu1 %vm487_vm2, %v1683_v49 }
  0x5f   : > { %1497 = vmatprep.mubr.msk.f32.mxu1 %vm1843_vm3, %v1844_v13 }
 0x114   : > { %v1396_v14 = vpop.f32.mrb[0].mxu0 }
 0x115   : > { %v546_v15 = vpop.f32.mrb[1].mxu0 }
 0x116   : > { %v1397_v16 = vpop.f32.mrb[2].mxu0 }
 0x117   : > { %v1505_v17 = vpack.c.bf16 %v1397_v16, %v1396_v14  ;;  %v549_v18 = vpop.f32.mrb[3].mxu0 }
 0x118   : > { %v1501_v20 = vpack.c.bf16 %v549_v18, %v546_v15  ;;  %v925_v15 = vld [vmem:[#allocation2] sm:$0xf] }
 0x119   : > { %v1416_v54 = vpop.f32.mrb[0].mxu1 }
 0x11a   : > { %1503 = vmatpush3.bf16.xpose.msk.msra.mxu0 %vm2080_vm4, %v1501_v20  ;;  %v739_v55 = vpop.f32.mrb[1].mxu1 }
 0x11b   : > { %1504 = vmatprep.subr.bf16.mxu0 %v1842_v12  ;;  %v1417_v56 = vpop.f32.mrb[2].mxu1 }
 0x11c   : > { %v1400_v21 = vpop.f32.mrb[4].mxu0  ;;  %v1536_v57 = vpack.c.bf16 %v1417_v56, %v1416_v54  ;;  %v742_v58 = vpop.f32.mrb[3].mxu1 }
 0x11d   : > { %v562_v22 = vpop.f32.mrb[5].mxu0  ;;  %v1533_v59 = vpack.c.bf16 %v742_v58, %v739_v55 }
 0x11e   : > { %v1401_v23 = vpop.f32.mrb[6].mxu0 }
 0x11f   : > { %v1513_v24 = vpack.c.bf16 %v1401_v23, %v1400_v21  ;;  %v565_v25 = vpop.f32.mrb[7].mxu0  ;;  %1534 = vmatpush3.bf16.msra.mxu1 %v1533_v59 }
 0x120   : > { %v1509_v26 = vpack.c.bf16 %v565_v25, %v562_v22  ;;  %1535 = vmatprep.subr.bf16.mxu1 %v1842_v12  ;;  %v942_v25 = vld [vmem:[#allocation3] sm:$0xf] }
 0x121   : > { %v1420_v60 = vpop.f32.mrb[4].mxu1 }
 0x122   : > { %1507 = vmatpush3.bf16.xpose.msk.msra.mxu0 %vm2080_vm4, %v1505_v17  ;;  %v755_v61 = vpop.f32.mrb[5].mxu1 }
 0x123   : > { %1508 = vmatprep.subr.bf16.mxu0 %v1842_v12  ;;  %v1421_v62 = vpop.f32.mrb[6].mxu1  ;;  %1537 = vmatpush3.bf16.msra.mxu1 %v1536_v57 }
 0x124   : > { %v1404_v27 = vpop.f32.mrb[8].mxu0  ;;  %v1542_v63 = vpack.c.bf16 %v1421_v62, %v1420_v60  ;;  %v758_v0 = vpop.f32.mrb[7].mxu1  ;;  %1538 = vmatprep.subr.bf16.mxu1 %v1842_v12 }
 0x125   : > { %v578_v28 = vpop.f32.mrb[9].mxu0  ;;  %v1539_v1 = vpack.c.bf16 %v758_v0, %v755_v61 }
 0x126   : > { %v1405_v29 = vpop.f32.mrb[10].mxu0 }
 0x127   : > { %v1521_v30 = vpack.c.bf16 %v1405_v29, %v1404_v27  ;;  %v581_v31 = vpop.f32.mrb[11].mxu0  ;;  %1540 = vmatpush3.bf16.msra.mxu1 %v1539_v1  ;;  %v950_v29 = vld [vmem:[#allocation4] sm:$0xf] }
 0x128   : > { %v1517_v32 = vpack.c.bf16 %v581_v31, %v578_v28  ;;  %1541 = vmatprep.subr.bf16.mxu1 %v1842_v12 }
 0x129   : > { %v1424_v2 = vpop.f32.mrb[8].mxu1 }
 0x12a   : > { %1511 = vmatpush3.bf16.xpose.msk.msra.mxu0 %vm2080_vm4, %v1509_v26  ;;  %v771_v3 = vpop.f32.mrb[9].mxu1 }
 0x12b   : > { %1512 = vmatprep.subr.bf16.mxu0 %v1842_v12  ;;  %v1425_v4 = vpop.f32.mrb[10].mxu1  ;;  %1543 = vmatpush3.bf16.msra.mxu1 %v1542_v63 }
 0x12c   : > { %v1408_v33 = vpop.f32.mrb[12].mxu0  ;;  %v1548_v5 = vpack.c.bf16 %v1425_v4, %v1424_v2  ;;  %v774_v6 = vpop.f32.mrb[11].mxu1  ;;  %1544 = vmatprep.subr.bf16.mxu1 %v1842_v12 }
 0x12d   : > { %v594_v34 = vpop.f32.mrb[13].mxu0  ;;  %v1545_v7 = vpack.c.bf16 %v774_v6, %v771_v3 }
 0x12e   : > { %v1409_v35 = vpop.f32.mrb[14].mxu0 }
 0x12f   : > { %v1529_v36 = vpack.c.bf16 %v1409_v35, %v1408_v33  ;;  %v597_v37 = vpop.f32.mrb[15].mxu0  ;;  %1546 = vmatpush3.bf16.msra.mxu1 %v1545_v7 }
 0x130   : > { %v1525_v38 = vpack.c.bf16 %v597_v37, %v594_v34  ;;  %1547 = vmatprep.subr.bf16.mxu1 %v1842_v12 }
 0x131   : > { %v1428_v8 = vpop.f32.mrb[12].mxu1 }
 0x132   : > { %1515 = vmatpush3.bf16.xpose.msk.msra.mxu0 %vm2080_vm4, %v1513_v24  ;;  %v787_v9 = vpop.f32.mrb[13].mxu1 }
 0x133   : > { %1516 = vmatprep.subr.bf16.mxu0 %v1842_v12  ;;  %v1429_v10 = vpop.f32.mrb[14].mxu1  ;;  %1549 = vmatpush3.bf16.msra.mxu1 %v1548_v5 }
 0x134   : > { %v1554_v11 = vpack.c.bf16 %v1429_v10, %v1428_v8  ;;  %v790_v13 = vpop.f32.mrb[15].mxu1  ;;  %1550 = vmatprep.subr.bf16.mxu1 %v1842_v12 }
 0x135   : > { %v1551_v14 = vpack.c.bf16 %v790_v13, %v787_v9 }
 0x137   : > { %1552 = vmatpush3.bf16.msra.mxu1 %v1551_v14 }
 0x138   : > { %1553 = vmatprep.subr.bf16.mxu1 %v1842_v12 }
 0x13a   : > { %1519 = vmatpush3.bf16.xpose.msk.msra.mxu0 %vm2080_vm4, %v1517_v32 }
 0x13b   : > { %1520 = vmatprep.subr.bf16.mxu0 %v1842_v12  ;;  %1555 = vmatpush3.bf16.msra.mxu1 %v1554_v11 }
 0x142   : > { %1523 = vmatpush3.bf16.xpose.msk.msra.mxu0 %vm2080_vm4, %v1521_v30 }
 0x143   : > { %1524 = vmatprep.subr.bf16.mxu0 %v1842_v12 }
 0x14a   : > { %1527 = vmatpush3.bf16.xpose.msk.msra.mxu0 %vm2080_vm4, %v1525_v38 }
 0x14b   : > { %1528 = vmatprep.subr.bf16.mxu0 %v1842_v12 }
 0x152   : > { %1531 = vmatpush3.bf16.xpose.msk.msra.mxu0 %vm2080_vm4, %v1529_v36 }
 0x159   : > { %1463 = vmatmul.mubr.msk.f32.vlgmr.msra.gmra.mrb[16].mxu0 %vm487_vm2, %v802_v39 }
 0x22c   : > { %v920_v50 = vpop.f32.mrb[16].mxu0 }
 0x22d   : > { %924 = vst [vmem:[%s355_s16] sm:$0xf] %v920_v50  ;;  %v1464_v51 = vpop.f32.mrb[17].mxu0  ;;  %v927_v52 = vsel %vm926_vm5, %v920_v50, -inf }
 0x22e   : > { %928 = vmax.xlane.f32.xlu0 %v927_v52 }
 0x2bb   : > { %v929_v16 = vpop.xlane.xlu0 %928 }
 0x2bc   : > { %v930_v17 = vmax.f32 %v925_v15, %v929_v16 }
 0x2be   : > { %v931_v18 = vsub.f32 %v925_v15, %v930_v17  ;;  %1030 = vst.msk [vmem:[#allocation2] sm:$0xf] %vm948_vm6, %v930_v17  ;;  %936 = vperm.xlu0 %1662, %v930_v17  }
 0x2c0   : > { %v932_v24 = vmul.f32 1.442695, %v931_v18 }
 0x2c5   : > { %v1035_v35 = vld [vmem:[#allocation2] sm:$0xf] (!%p1328_p8) }
 0x2c6   : > { %1036 = vst.msk [vmem:[%s2033_s30] sm:$0xf] (!%p1328_p8), %vm948_vm6, %v1035_v35 }
 0x33d   : > { %v937_v19 = vpop.permute.xlu0 %936 }
 0x33e   : > { %v939_v20 = vsub.f32 %v920_v50, %v937_v19 }
 0x340   : > { %v940_v21 = vmul.f32 1.442695, %v939_v20 }
 0x342   : > { %1684 = vpow2.f32 %v940_v21 }
 0x343   : > { %1686 = vpow2.f32 %v932_v24 }
 0x34c   : > { %v1685_v22 = vpop.eup %1684 }
 0x34d   : > { %1498 = vmatmul.mubr.f32.vlgmr.msra.gmra.mrb[16].mxu1 %v1685_v22  ;;  %v944_v23 = vsel %vm926_vm5, %v1685_v22, 0.0  ;;  %v1687_v12 = vpop.eup %1686 }
 0x34e   : > { %945 = vadd.xlane.f32.xlu1 %v944_v23  ;;  %v943_v26 = vmul.f32 %v1687_v12, %v942_v25 }
 0x35f   : > { %953 = vperm.xlu1 %1663, %v1687_v12  }
 0x3db   : > { %v946_v27 = vpop.xlane.xlu1 %945 }
 0x3dc   : > { %v947_v28 = vadd.f32 %v946_v27, %v943_v26 }
 0x3de   : > { %949 = vst.msk [vmem:[#allocation3] sm:$0xf] %vm948_vm6, %v947_v28 }
 0x3df   : > { %v954_v30 = vpop.permute.xlu1 %953 }
 0x3e0   : > { %v956_v31 = vmul.f32 %v954_v30, %v950_v29 }
 0x3e5   : > { %v1037_v36 = vld [vmem:[#allocation3] sm:$0xf] (!%p1328_p8) }
 0x3e6   : > { %1038 = vst.msk [vmem:[%s2048_s20] sm:$0xf] (!%p1328_p8), %vm948_vm6, %v1037_v36 }
 0x41d   : > { %1034 = sbr.rel (%p1328_p8) target bundleno = 1068 (0x42c), region = 48 }
 0x420   : > { %v1023_v32 = vpop.f32.mrb[16].mxu1 }
 0x421   : > { %v1027_v33 = vadd.f32 %v1023_v32, %v956_v31  ;;  %v1499_v34 = vpop.f32.mrb[17].mxu1 }
 0x423   : > { %1029 = vst.msk [vmem:[#allocation4] sm:$0xf] %vm1028_vm7, %v1027_v33 }
 0x42a   : > { %v1039_v37 = vld [vmem:[#allocation4] sm:$0xf] }
 0x42b   : > { %1040 = vst.msk [vmem:[%s374_s15] sm:$0xf] %vm1028_vm7, %v1039_v37 }
 0x42c PF: > { %s1332_s23 = sshll.u32 %s2026_s25, 6  ;;  %s2302_s8 = sld [smem:[#allocation25_spill]] }
 0x42d   : > { %s1070_s14 = sshll.u32 %s355_s16, 4  ;;  %s2303_s10 = sand.u32 1, %s1814_s9   ;;  %s1071_s14 = int_to_ptr.vmem [resolvable:$true] %s1070_s14 }
 0x42e   : > { %s1042_s30 = scalar_lea.sflag [#allocation6], %s2303_s10  ;;  %s1688_s18 = scalar_lea.vmem %s1071_s14, 64 }
 0x42f   : > { %p1689_p9 = scmp.ne.s32.totalorder %s1071_s14, %s1688_s18  ;;  %s1846_s20 = smov [#allocation5]  }
 0x430   : > { %s1692_s19 = sshll.u32 %s1846_s20, 4  ;;  %s1693_s19 = int_to_ptr.vmem [resolvable:$false] %s1692_s19 }
 0x431   : > { %p1690_p10 = pnand %p1689_p9, %p1968_p5  ;;  %s1694_s26 = scalar_lea.vmem %s1693_s19, 128 }
 0x432   : > { %s2160_s27 = scalar_lea.hbm %s2302_s8, %s1332_s23  ;;  %p1695_p0 = scmp.lt.s32.totalorder %s1071_s14, %s1693_s19 }
 0x433   : > { %p1691_p11 = pneg %p1690_p10  ;;  %p1696_p1 = scmp.lt.s32.totalorder %s1694_s26, %s1688_s18 }
 0x435   : > { %p1697_p3 = por %p1696_p1, %p1695_p0 }
 0x437   : > { %p1698_p2 = pnand %p1697_p3, %p1691_p11 }
 0x439   : > { %1701 = shalt.err (!%p1698_p2)
}
 0x43a   : > { %s1702_s21 = scalar_lea.hbm %s2160_s27, 64  ;;  %s1706_s13 = scalar_lea.hbm %s2302_s8, 256 }
 0x43b   : > { %p1703_p4 = scmp.ne.s32.totalorder %s2160_s27, %s1702_s21  ;;  %p1707_p9 = scmp.lt.u32.totalorder %s2160_s27, %s2302_s8 }
 0x43c   : > { %p1708_p10 = scmp.lt.u32.totalorder %s1706_s13, %s1702_s21  ;;  %p1710_p0 = scmp.lt.u32.totalorder %s1702_s21, %s2160_s27 }
 0x43d   : > { %p1704_p6 = pnand %p1703_p4, %p1968_p5 }
 0x43e   : > { %p1709_p11 = por %p1708_p10, %p1707_p9 }
 0x43f   : > { %p1705_p8 = pneg %p1704_p6 }
 0x440   : > { %p1711_p1 = por %p1710_p0, %p1709_p11 }
 0x442   : > { %p1712_p3 = pnand %p1711_p1, %p1705_p8 }
 0x444   : > { %1715 = shalt.err (!%p1712_p3)
}
 0x445   : > { %1556 = dma.vmem_to_hbm [thread:$0]  (%p1968_p5), %s1071_s14, 64, %s2160_s27, %s1042_s30  }
 0x446   : > { %s1333_s11 = sshll.u32 %s1826_s12, 6  ;;  %s1089_s5 = sshll.u32 %s374_s15, 4  ;;  %s1090_s5 = int_to_ptr.vmem [resolvable:$true] %s1089_s5 }
 0x447   : > { %s2304_s20 = sld [smem:[#allocation26_spill]]  ;;  %s2305_s26 = sand.u32 1, %s1802_s28  }
 0x448   : > { %s1055_s21 = scalar_lea.sflag [#allocation8], %s2305_s26  ;;  %s1716_s25 = scalar_lea.vmem %s1090_s5, 64 }
 0x449   : > { %p1717_p2 = scmp.ne.s32.totalorder %s1090_s5, %s1716_s25  ;;  %s1847_s29 = smov [#allocation7]  }
 0x44a   : > { %s1720_s16 = sshll.u32 %s1847_s29, 4  ;;  %s1721_s16 = int_to_ptr.vmem [resolvable:$false] %s1720_s16 }
 0x44b   : > { %p1718_p4 = pnand %p1717_p2, %p2001_p12  ;;  %s1722_s27 = scalar_lea.vmem %s1721_s16, 128 }
 0x44c   : > { %p1723_p5 = scmp.lt.s32.totalorder %s1090_s5, %s1721_s16  ;;  %p1724_p8 = scmp.lt.s32.totalorder %s1722_s27, %s1716_s25 }
 0x44d   : > { %s2189_s19 = scalar_lea.hbm %s2304_s20, %s1333_s11  ;;  %p1719_p6 = pneg %p1718_p4 }
 0x44e   : > { %p1725_p9 = por %p1724_p8, %p1723_p5 }
 0x450   : > { %p1726_p10 = pnand %p1725_p9, %p1719_p6 }
 0x452   : > { %1729 = shalt.err (!%p1726_p10)
}
 0x453   : > { %s1730_s12 = scalar_lea.hbm %s2189_s19, 64  ;;  %s1734_s14 = scalar_lea.hbm %s2304_s20, 128 }
 0x454   : > { %p1731_p11 = scmp.ne.s32.totalorder %s2189_s19, %s1730_s12  ;;  %p1735_p3 = scmp.lt.u32.totalorder %s2189_s19, %s2304_s20 }
 0x455   : > { %p1736_p2 = scmp.lt.u32.totalorder %s1734_s14, %s1730_s12  ;;  %p1738_p6 = scmp.lt.u32.totalorder %s1730_s12, %s2189_s19 }
 0x456   : > { %p1732_p0 = pnand %p1731_p11, %p2001_p12 }
 0x457   : > { %p1737_p4 = por %p1736_p2, %p1735_p3 }
 0x458   : > { %p1733_p1 = pneg %p1732_p0 }
 0x459   : > { %p1739_p5 = por %p1738_p6, %p1737_p4 }
 0x45b   : > { %p1740_p8 = pnand %p1739_p5, %p1733_p1 }
 0x45d   : > { %1743 = shalt.err (!%p1740_p8)
}
 0x45e   : > { %1557 = dma.vmem_to_hbm [thread:$0]  (%p2001_p12), %s1090_s5, 64, %s2189_s19, %s1055_s21  }
 0x45f PF: > { %s2306_s17 = sld [smem:[#allocation17_spill]]  ;;  %s2307_s23 = sld [smem:[#allocation13_spill]] }
 0x465   : > { %p1567_p9 = scmp.ge.s32.totalorder %s2306_s17, 2  ;;  %s1101_s10 = sand.u32 1, %s2307_s23  }
 0x466   : > { %s1102_s18 = scalar_lea.sflag [#allocation6], %s1101_s10 }
 0x467   : > { %p1561_p10 = pnand %p1567_p9, %p1980_p7 }
 0x469   : > { %1789 = dma.done.wait (!%p1561_p10), %s1102_s18, 64  }
 0x46a   : > { %1791 = vsyncadd (!%p1561_p10), %s1102_s18, 4294967232  ;;  %s2309_s26 = sld [smem:[#allocation11_spill]]  ;;  %p1564_p11 = pnand %p1567_p9, %p2007_p13 }
 0x470   : > { %s1124_s29 = sand.u32 1, %s2309_s26  }
 0x471   : > { %s1125_s16 = scalar_lea.sflag [#allocation8], %s1124_s29 }
 0x472   : > { %1793 = dma.done.wait (!%p1564_p11), %s1125_s16, 64  }
 0x473   : > { %1795 = vsyncadd (!%p1564_p11), %s1125_s16, 4294967232  ;;  %s25_s15 = sadd.s32 1, %s2306_s17   ;;  %s2311_s24 = sld [smem:[#allocation12_spill]] }
 0x474   : > { %p22_p12 = scmp.ge.s32.totalorder %s25_s15, 6   ;;  %s2312_s29 = sld [smem:[#allocation22_spill]] }
 0x475   : > { %s2313_s5 = sld [smem:[#allocation14_spill]]  ;;  %s2314_s10 = sld [smem:[#allocation23_spill]] }
 0x476   : > { %s2315_s11 = sld [smem:[#allocation15_spill]]  ;;  %s2316_s12 = sld [smem:[#allocation16_spill]] }
 0x477   : > { %s2317_s13 = sld [smem:[#allocation18_spill]]  ;;  %s2318_s14 = sld [smem:[#allocation20_spill]] }
 0x478   : > { %s2319_s27 = smov %s1802_s28  ;;  %s2321_s30 = smov %s1814_s9 }
 0x479   : > { %s2320_s28 = smov %s2311_s24  ;;  %24 = sbr.rel (!%p22_p12) target bundleno = 12 (0xc), region = 127 }
 0x47b   : > { %s2322_s9 = smov %s2313_s5 }
 0x480   :  { %1130 = vsyncpa [#allocation6], 1 }
 0x481   :  { %1132 = vsyncpa [#allocation6 + $0x1], 1 }
 0x482   :  { %1133 = vsyncpa [#allocation8], 1 }
 0x483   :  { %1135 = vsyncpa [#allocation8 + $0x1], 1 }

</bundles_post_ra>
